<compile_context>
chip_gen: v6e
topology: v6e:2x2x1
jax: 0.10.0
libtpu: 0.0.40
codegen_flags: <defaults>
</compile_context>

<pallas_src>
import functools

import jax
import jax.numpy as jnp
from jax import lax
from jax.experimental import pallas as pl
from jax.experimental.pallas import tpu as pltpu

KNOCKOUT = 1e30     # removes already-picked candidates from the running arg-min
_LANE = 128         # lane width: conv1 hidden/output dims are zero-padded to this

# Per-step VMEM budget for auto q_chunk selection; 24 MiB leaves pipeline /
# double-buffer headroom under the raised 48 MiB scoped limit (safe on v7x's
# 64 MiB physical VMEM; v5e/v6e have 128 MiB).
_VMEM_BUDGET = 24 * 1024 * 1024
_VMEM_LIMIT = 48 * 1024 * 1024


# ---------------------------------------------------------------------------
# Shared per-graph edge-conv math (runs inside the kernels).
# ---------------------------------------------------------------------------
def _edge_conv_core(x_full, x_q, wc, wn, b1, w2, b2, w3, b3, *, k):
    """DynamicEdgeConv(aggr='max') for Q query nodes against all P nodes.

    x_full: [P, C] all node features, x_q: [Q, C] query-node features.
    Returns [Q, H3] = max_{j in kNN_k(i)} relu-MLP([x_i, x_j - x_i]).
    """
    P, C = x_full.shape
    Q = x_q.shape[0]
    f32 = jnp.float32
    mxu = wc.dtype            # bf16 weights on v6e/v7x when requested; f32 otherwise

    # ---- exact kNN selection (f32, one Gram matmul) -------------------------
    # Row-comparable squared distance: ||x_j||^2 - 2<x_i, x_j> differs from
    # ||x_i - x_j||^2 only by a per-row constant, so the per-row k-smallest
    # selection (ties -> lower index, self included at distance 0) is unchanged.
    xsq = x_full * x_full
    sq_row = lax.dot_general(jnp.ones((1, C), f32), xsq,
                             (((1,), (1,)), ((), ())),
                             preferred_element_type=f32)               # [1, P]
    gram = lax.dot_general(x_q, x_full, (((1,), (1,)), ((), ())),
                           preferred_element_type=f32)                 # [Q, P]
    dist = sq_row - 2.0 * gram                                         # [Q, P]

    lane_id = lax.broadcasted_iota(jnp.int32, (Q, P), 1).astype(f32)
    dwork = dist
    picks = []                                   # k one-hot [Q, P] masks
    for _ in range(k):                           # k rounds of row-wise arg-min
        rmin = jnp.min(dwork, axis=1, keepdims=True)                   # [Q, 1]
        first = jnp.min(jnp.where(dwork == rmin, lane_id, float(P)),
                        axis=1, keepdims=True)                         # tie -> low idx
        pick = lane_id == first
        picks.append(pick.astype(f32))
        dwork = jnp.where(pick, KNOCKOUT, dwork)
    sel = jnp.concatenate(picks, axis=0)                               # [k*Q, P] 0/1

    # ---- edge MLP over only the k*Q selected edges ---------------------------
    # Layer 1 hoisted:  h1(i, j) = x_i @ (W1a - W1b) + x_j @ W1b + b1.
    # Neighbour features are gathered with one 0/1 selection matmul on the MXU;
    # the dense P*Q edge set is never materialised.
    a_c = jnp.dot(x_q.astype(mxu), wc, preferred_element_type=f32) + b1   # [Q, H1]
    xj = jnp.dot(sel.astype(mxu), x_full.astype(mxu),
                 preferred_element_type=f32)                              # [k*Q, C]
    h = jnp.dot(xj.astype(mxu), wn, preferred_element_type=f32)           # [k*Q, H1]
    h = (h.reshape(k, Q, -1) + a_c[None, :, :]).reshape(k * Q, -1)        # + centre term
    h = jnp.maximum(h, 0.0)
    h = jnp.maximum(jnp.dot(h.astype(mxu), w2, preferred_element_type=f32) + b2, 0.0)
    h = jnp.maximum(jnp.dot(h.astype(mxu), w3, preferred_element_type=f32) + b3, 0.0)

    # ---- max-aggregate over the k neighbours (all k*Q rows valid: k <= P) ----
    return jnp.max(h.reshape(k, Q, h.shape[1]), axis=0)                   # [Q, H3]


# ---------------------------------------------------------------------------
# Kernels.
# ---------------------------------------------------------------------------
def _edge_conv_kernel(x_ref, wc_ref, wn_ref, b1_ref, w2_ref, b2_ref,
                      w3_ref, b3_ref, o_ref, *, k, q_chunk):
    qc = pl.program_id(1)
    start = pl.multiple_of(qc * q_chunk, q_chunk)
    x_full = x_ref[0]                                    # [P, C] (resident per graph)
    x_q = x_ref[0, pl.ds(start, q_chunk), :]             # [Q, C]
    o_ref[0, :, :] = _edge_conv_core(
        x_full, x_q, wc_ref[...], wn_ref[...], b1_ref[...], w2_ref[...],
        b2_ref[...], w3_ref[...], b3_ref[...], k=k)      # one lane-dense store


def _edge_conv_pool_head_kernel(x_ref, wc_ref, wn_ref, b1_ref, w2_ref, b2_ref,
                                w3_ref, b3_ref, w0_ref, b0_ref,
                                l1w_ref, l1b_ref, l2w_ref, l2b_ref,
                                l3w_ref, l3b_ref, o_ref, pooled_acc,
                                *, k, q_chunk):
    """conv2 + relu(lin0) + global_max_pool + full head tail, fused per graph."""
    f32 = jnp.float32
    qc = pl.program_id(1)
    start = pl.multiple_of(qc * q_chunk, q_chunk)
    x_full = x_ref[0]
    x_q = x_ref[0, pl.ds(start, q_chunk), :]
    feat = _edge_conv_core(
        x_full, x_q, wc_ref[...], wn_ref[...], b1_ref[...], w2_ref[...],
        b2_ref[...], w3_ref[...], b3_ref[...], k=k)                       # [Q, 256]
    w0 = w0_ref[...]
    h0 = jnp.maximum(jnp.dot(feat.astype(w0.dtype), w0,
                             preferred_element_type=f32) + b0_ref[...], 0.0)
    pooled = jnp.max(h0, axis=0, keepdims=True)                           # [1, 512]

    # Running global-max-pool lives in a VMEM scratch; the q axis is 'arbitrary'
    # (sequential) so this read-modify-write is race-free.
    @pl.when(qc == 0)
    def _():
        pooled_acc[...] = pooled

    @pl.when(qc != 0)
    def _():
        pooled_acc[...] = jnp.maximum(pooled_acc[...], pooled)

    # Head tail on the last query chunk of each graph: relu(lin1) -> relu(lin2)
    # -> dropout (identity at inference) -> lin3 -> log_softmax.
    @pl.when(qc == pl.num_programs(1) - 1)
    def _():
        p = pooled_acc[...]
        h = jnp.maximum(jnp.dot(p, l1w_ref[...], preferred_element_type=f32)
                        + l1b_ref[...], 0.0)
        h = jnp.maximum(jnp.dot(h, l2w_ref[...], preferred_element_type=f32)
                        + l2b_ref[...], 0.0)
        # TODO(synk): F.dropout(p=0.5) is identity here (inference); training-mode
        # dropout would use pltpu.prng_seed / pltpu.prng_random_bits.
        logits = jnp.dot(h, l3w_ref[...], preferred_element_type=f32) + l3b_ref[...]
        m = jnp.max(logits, axis=1, keepdims=True)
        lse = m + jnp.log(jnp.sum(jnp.exp(logits - m), axis=1, keepdims=True))
        o_ref[0, :, :] = logits - lse


# ---------------------------------------------------------------------------
# Weight preparation (layer-1 hoist split + lane padding).
# ---------------------------------------------------------------------------
def _pad_cols(a, width):
    return a if a.shape[1] == width else jnp.pad(a, ((0, 0), (0, width - a.shape[1])))


def _pad_rows(a, height):
    return a if a.shape[0] == height else jnp.pad(a, ((0, height - a.shape[0]), (0, 0)))


def _prep_edge_conv_weights(params, *, c_in, mxu_dtype, c_pad=None, h_pad=None):
    """params = (w1 [2*c_in, H1], b1, w2, b2, w3, b3) of one edge MLP.

    Splits layer 1 so it can be hoisted ([x_i, x_j - x_i] @ W1 =
    x_i @ (W1a - W1b) + x_j @ W1b), optionally zero-pads input rows (c_pad: node
    features arrive zero-padded) and hidden/output widths (h_pad: lane-dense
    128-wide tiles).  Zero padding is exact: padded feature columns are always 0
    and padded weight rows are 0, so outputs match the unpadded MLP.
    """
    w1, b1, w2, b2, w3, b3 = params
    w1a, w1b = w1[:c_in], w1[c_in:]
    if c_pad is not None:
        w1a, w1b = _pad_rows(w1a, c_pad), _pad_rows(w1b, c_pad)
    if h_pad is not None:
        w1a, w1b, b1 = _pad_cols(w1a, h_pad), _pad_cols(w1b, h_pad), _pad_cols(b1, h_pad)
        w2, b2 = _pad_cols(_pad_rows(w2, h_pad), h_pad), _pad_cols(b2, h_pad)
        w3, b3 = _pad_cols(_pad_rows(w3, h_pad), h_pad), _pad_cols(b3, h_pad)
    wc = (w1a - w1b).astype(mxu_dtype)        # acts on x_i (centre)
    wn = w1b.astype(mxu_dtype)                # acts on x_j (neighbour)
    return (wc, wn, b1, w2.astype(mxu_dtype), b2, w3.astype(mxu_dtype), b3)


# ---------------------------------------------------------------------------
# VMEM / cost bookkeeping.
# ---------------------------------------------------------------------------
def _edge_conv_step_bytes(P, Q, C, H1, H3, k):
    """Rough live f32 bytes per grid step (kNN work + gathered edge MLP)."""
    kq = k * Q
    words = (P * C                             # resident x block
             + 4 * Q * P                       # dist / dwork / lane_id / temps
             + kq * P                          # 0/1 selection matrix
             + kq * (C + 2 * max(H1, H3))      # gathered x_j + edge-MLP activations
             + Q * H3)                         # output tile
    return 4 * words


def _auto_q_chunk(P, C, H1, H3, k, budget_bytes):
    """Largest multiple-of-8 divisor of P whose per-step VMEM fits the budget."""
    best = 8
    for q in range(8, P + 1, 8):
        if P % q == 0 and _edge_conv_step_bytes(P, q, C, H1, H3, k) <= budget_bytes:
            best = q
    return best


def _cost_estimate(B, P, Q, C, H1, H2, H3, k, extra_flops=0):
    steps = B * (P // Q)
    flops_step = 2 * (Q * P * C                       # gram
                      + k * Q * P * C                 # neighbour gather
                      + k * Q * C * H1 + Q * C * H1   # layer 1 (neighbour + centre)
                      + k * Q * H1 * H2 + k * Q * H2 * H3)
    bytes_acc = 4 * (B * P * C + B * P * H3
                     + 2 * C * H1 + H1 * H2 + H2 * H3)
    return pl.CostEstimate(flops=int(steps * flops_step + extra_flops),
                           transcendentals=0,
                           bytes_accessed=int(bytes_acc))


# ---------------------------------------------------------------------------
# Wrappers.
# ---------------------------------------------------------------------------
def dynamic_edge_conv(x, params, *, k, q_chunk=None, vmem_budget=_VMEM_BUDGET):
    """x: [B, P, C] -> [B, P, H3]  (DynamicEdgeConv, aggr='max')."""
    B, P, C = x.shape
    wc, wn, b1, w2, b2, w3, b3 = params
    H1, H2, H3 = wc.shape[1], w2.shape[1], w3.shape[1]
    Q = q_chunk if q_chunk is not None else _auto_q_chunk(P, C, H1, H3, k, vmem_budget)
    assert P % Q == 0 and Q % 8 == 0 and k <= P
    weights = (wc, wn, b1, w2, b2, w3, b3)
    grid_spec = pltpu.PrefetchScalarGridSpec(
        num_scalar_prefetch=0,
        grid=(B, P // Q),
        in_specs=[pl.BlockSpec((1, P, C), lambda b, q: (b, 0, 0))]
                 + [pl.BlockSpec(w.shape, lambda b, q: (0, 0)) for w in weights],
        out_specs=pl.BlockSpec((1, Q, H3), lambda b, q: (b, q, 0)),
    )
    return pl.pallas_call(
        functools.partial(_edge_conv_kernel, k=k, q_chunk=Q),
        out_shape=jax.ShapeDtypeStruct((B, P, H3), jnp.float32),
        grid_spec=grid_spec,
        compiler_params=pltpu.CompilerParams(
            dimension_semantics=("parallel", "parallel"),
            vmem_limit_bytes=_VMEM_LIMIT),
        cost_estimate=_cost_estimate(B, P, Q, C, H1, H2, H3, k),
    )(x, *weights)


def dynamic_edge_conv_pool_head(x, conv_params, head_params, num_classes, *,
                                k, q_chunk=None, vmem_budget=_VMEM_BUDGET):
    """Fused conv2 + relu(lin0) + global_max_pool + head.  x: [B,P,C] -> [B,NC]."""
    B, P, C = x.shape
    wc, wn, b1, w2, b2, w3, b3 = conv_params
    H1, H2, H3 = wc.shape[1], w2.shape[1], w3.shape[1]
    Q = q_chunk if q_chunk is not None else _auto_q_chunk(P, C, H1, H3, k, vmem_budget)
    assert P % Q == 0 and Q % 8 == 0 and k <= P
    w0, b0, l1w, l1b, l2w, l2b, l3w, l3b = head_params
    H0 = w0.shape[1]
    weights = (wc, wn, b1, w2, b2, w3, b3, w0, b0, l1w, l1b, l2w, l2b, l3w, l3b)
    grid_spec = pltpu.PrefetchScalarGridSpec(
        num_scalar_prefetch=0,
        grid=(B, P // Q),
        in_specs=[pl.BlockSpec((1, P, C), lambda b, q: (b, 0, 0))]
                 + [pl.BlockSpec(w.shape, lambda b, q: (0, 0)) for w in weights],
        out_specs=pl.BlockSpec((1, 1, num_classes), lambda b, q: (b, 0, 0)),
        scratch_shapes=[pltpu.VMEM((1, H0), jnp.float32)],
    )
    out = pl.pallas_call(
        functools.partial(_edge_conv_pool_head_kernel, k=k, q_chunk=Q),
        out_shape=jax.ShapeDtypeStruct((B, 1, num_classes), jnp.float32),
        grid_spec=grid_spec,
        compiler_params=pltpu.CompilerParams(
            # q carries the running pooled max in a scratch -> must stay
            # 'arbitrary'.  B shards across v7x's two TensorCores (want B >= 2
            # per call for full megacore utilisation of the expensive conv2).
            dimension_semantics=("parallel", "arbitrary"),
            vmem_limit_bytes=_VMEM_LIMIT),
        cost_estimate=_cost_estimate(B, P, Q, C, H1, H2, H3, k,
                                     extra_flops=2 * B * P * H3 * H0),
    )(x, *weights)
    return out[:, 0, :]


# ---------------------------------------------------------------------------
# Parameter init (PyTorch-style Linear) and full forward.
# ---------------------------------------------------------------------------
def _linear(key, fan_in, fan_out):
    kw, kb = jax.random.split(key)
    bound = 1.0 / float(fan_in) ** 0.5
    w = jax.random.uniform(kw, (fan_in, fan_out), jnp.float32, -bound, bound)
    b = jax.random.uniform(kb, (1, fan_out), jnp.float32, -bound, bound)
    return w, b


def init_net_params(key, num_classes):
    keys = jax.random.split(key, 10)
    # conv1 edge MLP: Lin(6,64) ReLU Lin(64,64) ReLU Lin(64,64) ReLU
    w1, b1 = _linear(keys[0], 6, 64)
    w2, b2 = _linear(keys[1], 64, 64)
    w3, b3 = _linear(keys[2], 64, 64)
    conv1 = (w1, b1, w2, b2, w3, b3)
    # conv2 edge MLP: Lin(128,128) ReLU Lin(128,128) ReLU Lin(128,256) ReLU
    w1, b1 = _linear(keys[3], 128, 128)
    w2, b2 = _linear(keys[4], 128, 128)
    w3, b3 = _linear(keys[5], 128, 256)
    conv2 = (w1, b1, w2, b2, w3, b3)
    # head: lin0(256,512) lin1(512,256) lin2(256,256) lin3(256,num_classes)
    w0, b0 = _linear(keys[6], 256, 512)
    l1w, l1b = _linear(keys[7], 512, 256)
    l2w, l2b = _linear(keys[8], 256, 256)
    l3w, l3b = _linear(keys[9], 256, num_classes)
    head_p = (w0, b0, l1w, l1b, l2w, l2b, l3w, l3b)
    return conv1, conv2, head_p


def net_forward(pos, batch, params, *, k, num_classes, num_graphs,
                q_chunk=None, mxu_dtype=jnp.float32, vmem_budget=_VMEM_BUDGET):
    """pos [N, 3], batch [N] -> [num_graphs, num_classes] log-probabilities."""
    # TODO(synk): graphs are assumed contiguous & equal-sized (fixed-size batches);
    # `batch` is only implied by the static num_graphs (jit-safe).
    del batch
    conv1_p, conv2_p, head_p = params
    n, c = pos.shape
    p_per_graph = n // num_graphs
    w0, b0, l1w, l1b, l2w, l2b, l3w, l3b = head_p

    # conv1 widths zero-padded 64 -> 128 for lane-dense tiles; conv2's first
    # layer gets matching zero-padded rows so padded feature columns are inert.
    conv1_w = _prep_edge_conv_weights(conv1_p, c_in=c, mxu_dtype=mxu_dtype,
                                      h_pad=_LANE)
    conv2_w = _prep_edge_conv_weights(conv2_p, c_in=conv2_p[0].shape[0] // 2,
                                      mxu_dtype=mxu_dtype, c_pad=_LANE)
    head_w = (w0.astype(mxu_dtype), b0, l1w, l1b, l2w, l2b, l3w, l3b)

    x = pos.reshape(num_graphs, p_per_graph, c)                           # [B, P, 3]
    x = dynamic_edge_conv(x, conv1_w, k=k, q_chunk=q_chunk,
                          vmem_budget=vmem_budget)                        # [B, P, 128]
    return dynamic_edge_conv_pool_head(x, conv2_w, head_w, num_classes, k=k,
                                       q_chunk=q_chunk, vmem_budget=vmem_budget)


# ---------------------------------------------------------------------------
# Pure-JAX reference (correctness check at toy sizes).
# ---------------------------------------------------------------------------
def _reference_forward(pos, params, *, k, num_graphs):
    conv1_p, conv2_p, head_p = params
    x = pos.reshape(num_graphs, pos.shape[0] // num_graphs, -1)

    def edge_conv(x, p):
        w1, b1, w2, b2, w3, b3 = p

        def one_graph(xg):
            d = jnp.sum((xg[:, None, :] - xg[None, :, :]) ** 2, axis=-1)  # [P, P]
            idx = jnp.argsort(d, axis=-1)[:, :k]          # stable: ties -> low index
            xj = xg[idx]                                  # [P, k, C]
            xi = jnp.broadcast_to(xg[:, None, :], xj.shape)
            e = jnp.concatenate([xi, xj - xi], axis=-1)
            h = jax.nn.relu(e @ w1 + b1)
            h = jax.nn.relu(h @ w2 + b2)
            h = jax.nn.relu(h @ w3 + b3)
            return jnp.max(h, axis=1)

        return jax.vmap(one_graph)(x)

    x = edge_conv(x, conv1_p)
    x = edge_conv(x, conv2_p)
    w0, b0, l1w, l1b, l2w, l2b, l3w, l3b = head_p
    x = jax.nn.relu(x @ w0 + b0)
    x = jnp.max(x, axis=1)
    x = jax.nn.relu(x @ l1w + l1b)
    x = jax.nn.relu(x @ l2w + l2b)
    logits = x @ l3w + l3b
    return jax.nn.log_softmax(logits, axis=-1)


if __name__ == "__main__":
    B, P, K, NUM_CLASSES = 2, 32, 20, 10          # module hard-codes k=20 -> P >= k
    key = jax.random.PRNGKey(0)
    kpos, kparam = jax.random.split(key)
    pos = jax.random.normal(kpos, (B * P, 3), jnp.float32)
    batch = jnp.repeat(jnp.arange(B, dtype=jnp.int32), P)
    params = init_net_params(kparam, NUM_CLASSES)

    out = net_forward(pos, batch, params, k=K, num_classes=NUM_CLASSES,
                      num_graphs=B, q_chunk=16)   # q_chunk exercises query tiling
    out = jax.block_until_ready(out)

    assert out.shape == (B, NUM_CLASSES)
    assert bool(jnp.all(jnp.isfinite(out)))
    with jax.default_matmul_precision("highest"):
        ref = _reference_forward(pos, params, k=K, num_graphs=B)
    ref = jax.block_until_ready(ref)
    assert float(jnp.max(jnp.abs(out - ref))) < 5e-3, "mismatch vs pure-JAX reference"
    print("KERNEL_OK")
</pallas_src>

<mosaic_0001>
module attributes {stable_mosaic.version = 11 : i64} {
  func.func @_edge_conv_kernel(%arg0: i32, %arg1: i32, %arg2: memref<1x32x3xf32, #tpu.memory_space<vmem>>, %arg3: memref<3x128xf32, #tpu.memory_space<vmem>>, %arg4: memref<3x128xf32, #tpu.memory_space<vmem>>, %arg5: memref<1x128xf32, #tpu.memory_space<vmem>>, %arg6: memref<128x128xf32, #tpu.memory_space<vmem>>, %arg7: memref<1x128xf32, #tpu.memory_space<vmem>>, %arg8: memref<128x128xf32, #tpu.memory_space<vmem>>, %arg9: memref<1x128xf32, #tpu.memory_space<vmem>>, %arg10: memref<1x16x128xf32, #tpu.memory_space<vmem>>) attributes {dimension_semantics = [#tpu.dimension_semantics<parallel>, #tpu.dimension_semantics<parallel>], iteration_bounds = array<i64: 2, 2>, scalar_prefetch = 0 : i64, scratch_operands = 0 : i64, tpu.core_type = #tpu.core_type<tc>, window_params = [{transform_indices = @transform_0, window_bounds = array<i64: 1, 32, 3>}, {pipeline_mode = #tpu.pipeline_mode<synchronous>, transform_indices = @transform_1, window_bounds = array<i64: 3, 128>}, {pipeline_mode = #tpu.pipeline_mode<synchronous>, transform_indices = @transform_2, window_bounds = array<i64: 3, 128>}, {pipeline_mode = #tpu.pipeline_mode<synchronous>, transform_indices = @transform_3, window_bounds = array<i64: 1, 128>}, {pipeline_mode = #tpu.pipeline_mode<synchronous>, transform_indices = @transform_4, window_bounds = array<i64: 128, 128>}, {pipeline_mode = #tpu.pipeline_mode<synchronous>, transform_indices = @transform_5, window_bounds = array<i64: 1, 128>}, {pipeline_mode = #tpu.pipeline_mode<synchronous>, transform_indices = @transform_6, window_bounds = array<i64: 128, 128>}, {pipeline_mode = #tpu.pipeline_mode<synchronous>, transform_indices = @transform_7, window_bounds = array<i64: 1, 128>}, {transform_indices = @transform_8, window_bounds = array<i64: 1, 16, 128>}]} {
    %c16_i32 = arith.constant 16 : i32
    %0 = arith.muli %arg1, %c16_i32 : i32
    %1 = tpu.assume_multiple %0, 16 : i32
    %c0 = arith.constant 0 : index
    %c0_0 = arith.constant 0 : index
    %c0_1 = arith.constant 0 : index
    %2 = vector.load %arg2[%c0, %c0_0, %c0_1] : memref<1x32x3xf32, #tpu.memory_space<vmem>>, vector<1x32x3xf32>
    %3 = vector.shape_cast %2 : vector<1x32x3xf32> to vector<32x3xf32>
    %c0_2 = arith.constant 0 : index
    %4 = arith.index_cast %1 : i32 to index
    %c0_3 = arith.constant 0 : index
    %5 = vector.load %arg2[%c0_2, %4, %c0_3] : memref<1x32x3xf32, #tpu.memory_space<vmem>>, vector<1x16x3xf32>
    %6 = vector.shape_cast %5 : vector<1x16x3xf32> to vector<16x3xf32>
    %c0_4 = arith.constant 0 : index
    %c0_5 = arith.constant 0 : index
    %7 = vector.load %arg3[%c0_4, %c0_5] : memref<3x128xf32, #tpu.memory_space<vmem>>, vector<3x128xf32>
    %c0_6 = arith.constant 0 : index
    %c0_7 = arith.constant 0 : index
    %8 = vector.load %arg4[%c0_6, %c0_7] : memref<3x128xf32, #tpu.memory_space<vmem>>, vector<3x128xf32>
    %c0_8 = arith.constant 0 : index
    %c0_9 = arith.constant 0 : index
    %9 = vector.load %arg5[%c0_8, %c0_9] : memref<1x128xf32, #tpu.memory_space<vmem>>, vector<1x128xf32>
    %c0_10 = arith.constant 0 : index
    %c0_11 = arith.constant 0 : index
    %10 = vector.load %arg6[%c0_10, %c0_11] : memref<128x128xf32, #tpu.memory_space<vmem>>, vector<128x128xf32>
    %c0_12 = arith.constant 0 : index
    %c0_13 = arith.constant 0 : index
    %11 = vector.load %arg7[%c0_12, %c0_13] : memref<1x128xf32, #tpu.memory_space<vmem>>, vector<1x128xf32>
    %c0_14 = arith.constant 0 : index
    %c0_15 = arith.constant 0 : index
    %12 = vector.load %arg8[%c0_14, %c0_15] : memref<128x128xf32, #tpu.memory_space<vmem>>, vector<128x128xf32>
    %c0_16 = arith.constant 0 : index
    %c0_17 = arith.constant 0 : index
    %13 = vector.load %arg9[%c0_16, %c0_17] : memref<1x128xf32, #tpu.memory_space<vmem>>, vector<1x128xf32>
    %14 = arith.mulf %3, %3 : vector<32x3xf32>
    %cst = arith.constant 1.000000e+00 : f32
    %15 = vector.broadcast %cst : f32 to vector<1x3xf32>
    %cst_18 = arith.constant dense<0.000000e+00> : vector<1x32xf32>
    %16 = tpu.matmul %15, %14, %cst_18 {dimension_numbers = #tpu.dot_dimension_numbers<[1], [1], [0], [0], [0, 0, 1, 0], [], []>} : vector<1x3xf32>, vector<32x3xf32>, vector<1x32xf32> -> vector<1x32xf32>
    %cst_19 = arith.constant dense<0.000000e+00> : vector<16x32xf32>
    %17 = tpu.matmul %6, %3, %cst_19 {dimension_numbers = #tpu.dot_dimension_numbers<[1], [1], [0], [0], [0, 0, 1, 0], [], []>} : vector<16x3xf32>, vector<32x3xf32>, vector<16x32xf32> -> vector<16x32xf32>
    %cst_20 = arith.constant 2.000000e+00 : f32
    %18 = vector.broadcast %cst_20 : f32 to vector<16x32xf32>
    %19 = arith.mulf %18, %17 : vector<16x32xf32>
    %20 = vector.broadcast %16 : vector<1x32xf32> to vector<16x32xf32>
    %21 = arith.subf %20, %19 : vector<16x32xf32>
    %22 = tpu.iota {dimensions = array<i32: 1>} : vector<16x32xi32>
    %23 = arith.sitofp %22 : vector<16x32xi32> to vector<16x32xf32>
    %cst_21 = arith.constant dense<0x7F800000> : vector<16xf32>
    %24 = vector.multi_reduction <minimumf>, %21, %cst_21 [1] : vector<16x32xf32> to vector<16xf32>
    %25 = vector.shape_cast %24 : vector<16xf32> to vector<16x1xf32>
    %26 = vector.broadcast %25 : vector<16x1xf32> to vector<16x32xf32>
    %27 = arith.cmpf oeq, %21, %26 : vector<16x32xf32>
    %cst_22 = arith.constant 3.200000e+01 : f32
    %28 = vector.broadcast %cst_22 : f32 to vector<16x32xf32>
    %29 = arith.select %27, %23, %28 : vector<16x32xi1>, vector<16x32xf32>
    %cst_23 = arith.constant dense<0x7F800000> : vector<16xf32>
    %30 = vector.multi_reduction <minimumf>, %29, %cst_23 [1] : vector<16x32xf32> to vector<16xf32>
    %31 = vector.shape_cast %30 : vector<16xf32> to vector<16x1xf32>
    %32 = vector.broadcast %31 : vector<16x1xf32> to vector<16x32xf32>
    %33 = arith.cmpf oeq, %23, %32 : vector<16x32xf32>
    %34 = arith.extui %33 : vector<16x32xi1> to vector<16x32xi32>
    %35 = arith.sitofp %34 : vector<16x32xi32> to vector<16x32xf32>
    %cst_24 = arith.constant 1.000000e+30 : f32
    %36 = vector.broadcast %cst_24 : f32 to vector<16x32xf32>
    %37 = arith.select %33, %36, %21 : vector<16x32xi1>, vector<16x32xf32>
    %cst_25 = arith.constant dense<0x7F800000> : vector<16xf32>
    %38 = vector.multi_reduction <minimumf>, %37, %cst_25 [1] : vector<16x32xf32> to vector<16xf32>
    %39 = vector.shape_cast %38 : vector<16xf32> to vector<16x1xf32>
    %40 = vector.broadcast %39 : vector<16x1xf32> to vector<16x32xf32>
    %41 = arith.cmpf oeq, %37, %40 : vector<16x32xf32>
    %cst_26 = arith.constant 3.200000e+01 : f32
    %42 = vector.broadcast %cst_26 : f32 to vector<16x32xf32>
    %43 = arith.select %41, %23, %42 : vector<16x32xi1>, vector<16x32xf32>
    %cst_27 = arith.constant dense<0x7F800000> : vector<16xf32>
    %44 = vector.multi_reduction <minimumf>, %43, %cst_27 [1] : vector<16x32xf32> to vector<16xf32>
    %45 = vector.shape_cast %44 : vector<16xf32> to vector<16x1xf32>
    %46 = vector.broadcast %45 : vector<16x1xf32> to vector<16x32xf32>
    %47 = arith.cmpf oeq, %23, %46 : vector<16x32xf32>
    %48 = arith.extui %47 : vector<16x32xi1> to vector<16x32xi32>
    %49 = arith.sitofp %48 : vector<16x32xi32> to vector<16x32xf32>
    %cst_28 = arith.constant 1.000000e+30 : f32
    %50 = vector.broadcast %cst_28 : f32 to vector<16x32xf32>
    %51 = arith.select %47, %50, %37 : vector<16x32xi1>, vector<16x32xf32>
    %cst_29 = arith.constant dense<0x7F800000> : vector<16xf32>
    %52 = vector.multi_reduction <minimumf>, %51, %cst_29 [1] : vector<16x32xf32> to vector<16xf32>
    %53 = vector.shape_cast %52 : vector<16xf32> to vector<16x1xf32>
    %54 = vector.broadcast %53 : vector<16x1xf32> to vector<16x32xf32>
    %55 = arith.cmpf oeq, %51, %54 : vector<16x32xf32>
    %cst_30 = arith.constant 3.200000e+01 : f32
    %56 = vector.broadcast %cst_30 : f32 to vector<16x32xf32>
    %57 = arith.select %55, %23, %56 : vector<16x32xi1>, vector<16x32xf32>
    %cst_31 = arith.constant dense<0x7F800000> : vector<16xf32>
    %58 = vector.multi_reduction <minimumf>, %57, %cst_31 [1] : vector<16x32xf32> to vector<16xf32>
    %59 = vector.shape_cast %58 : vector<16xf32> to vector<16x1xf32>
    %60 = vector.broadcast %59 : vector<16x1xf32> to vector<16x32xf32>
    %61 = arith.cmpf oeq, %23, %60 : vector<16x32xf32>
    %62 = arith.extui %61 : vector<16x32xi1> to vector<16x32xi32>
    %63 = arith.sitofp %62 : vector<16x32xi32> to vector<16x32xf32>
    %cst_32 = arith.constant 1.000000e+30 : f32
    %64 = vector.broadcast %cst_32 : f32 to vector<16x32xf32>
    %65 = arith.select %61, %64, %51 : vector<16x32xi1>, vector<16x32xf32>
    %cst_33 = arith.constant dense<0x7F800000> : vector<16xf32>
    %66 = vector.multi_reduction <minimumf>, %65, %cst_33 [1] : vector<16x32xf32> to vector<16xf32>
    %67 = vector.shape_cast %66 : vector<16xf32> to vector<16x1xf32>
    %68 = vector.broadcast %67 : vector<16x1xf32> to vector<16x32xf32>
    %69 = arith.cmpf oeq, %65, %68 : vector<16x32xf32>
    %cst_34 = arith.constant 3.200000e+01 : f32
    %70 = vector.broadcast %cst_34 : f32 to vector<16x32xf32>
    %71 = arith.select %69, %23, %70 : vector<16x32xi1>, vector<16x32xf32>
    %cst_35 = arith.constant dense<0x7F800000> : vector<16xf32>
    %72 = vector.multi_reduction <minimumf>, %71, %cst_35 [1] : vector<16x32xf32> to vector<16xf32>
    %73 = vector.shape_cast %72 : vector<16xf32> to vector<16x1xf32>
    %74 = vector.broadcast %73 : vector<16x1xf32> to vector<16x32xf32>
    %75 = arith.cmpf oeq, %23, %74 : vector<16x32xf32>
    %76 = arith.extui %75 : vector<16x32xi1> to vector<16x32xi32>
    %77 = arith.sitofp %76 : vector<16x32xi32> to vector<16x32xf32>
    %cst_36 = arith.constant 1.000000e+30 : f32
    %78 = vector.broadcast %cst_36 : f32 to vector<16x32xf32>
    %79 = arith.select %75, %78, %65 : vector<16x32xi1>, vector<16x32xf32>
    %cst_37 = arith.constant dense<0x7F800000> : vector<16xf32>
    %80 = vector.multi_reduction <minimumf>, %79, %cst_37 [1] : vector<16x32xf32> to vector<16xf32>
    %81 = vector.shape_cast %80 : vector<16xf32> to vector<16x1xf32>
    %82 = vector.broadcast %81 : vector<16x1xf32> to vector<16x32xf32>
    %83 = arith.cmpf oeq, %79, %82 : vector<16x32xf32>
    %cst_38 = arith.constant 3.200000e+01 : f32
    %84 = vector.broadcast %cst_38 : f32 to vector<16x32xf32>
    %85 = arith.select %83, %23, %84 : vector<16x32xi1>, vector<16x32xf32>
    %cst_39 = arith.constant dense<0x7F800000> : vector<16xf32>
    %86 = vector.multi_reduction <minimumf>, %85, %cst_39 [1] : vector<16x32xf32> to vector<16xf32>
    %87 = vector.shape_cast %86 : vector<16xf32> to vector<16x1xf32>
    %88 = vector.broadcast %87 : vector<16x1xf32> to vector<16x32xf32>
    %89 = arith.cmpf oeq, %23, %88 : vector<16x32xf32>
    %90 = arith.extui %89 : vector<16x32xi1> to vector<16x32xi32>
    %91 = arith.sitofp %90 : vector<16x32xi32> to vector<16x32xf32>
    %cst_40 = arith.constant 1.000000e+30 : f32
    %92 = vector.broadcast %cst_40 : f32 to vector<16x32xf32>
    %93 = arith.select %89, %92, %79 : vector<16x32xi1>, vector<16x32xf32>
    %cst_41 = arith.constant dense<0x7F800000> : vector<16xf32>
    %94 = vector.multi_reduction <minimumf>, %93, %cst_41 [1] : vector<16x32xf32> to vector<16xf32>
    %95 = vector.shape_cast %94 : vector<16xf32> to vector<16x1xf32>
    %96 = vector.broadcast %95 : vector<16x1xf32> to vector<16x32xf32>
    %97 = arith.cmpf oeq, %93, %96 : vector<16x32xf32>
    %cst_42 = arith.constant 3.200000e+01 : f32
    %98 = vector.broadcast %cst_42 : f32 to vector<16x32xf32>
    %99 = arith.select %97, %23, %98 : vector<16x32xi1>, vector<16x32xf32>
    %cst_43 = arith.constant dense<0x7F800000> : vector<16xf32>
    %100 = vector.multi_reduction <minimumf>, %99, %cst_43 [1] : vector<16x32xf32> to vector<16xf32>
    %101 = vector.shape_cast %100 : vector<16xf32> to vector<16x1xf32>
    %102 = vector.broadcast %101 : vector<16x1xf32> to vector<16x32xf32>
    %103 = arith.cmpf oeq, %23, %102 : vector<16x32xf32>
    %104 = arith.extui %103 : vector<16x32xi1> to vector<16x32xi32>
    %105 = arith.sitofp %104 : vector<16x32xi32> to vector<16x32xf32>
    %cst_44 = arith.constant 1.000000e+30 : f32
    %106 = vector.broadcast %cst_44 : f32 to vector<16x32xf32>
    %107 = arith.select %103, %106, %93 : vector<16x32xi1>, vector<16x32xf32>
    %cst_45 = arith.constant dense<0x7F800000> : vector<16xf32>
    %108 = vector.multi_reduction <minimumf>, %107, %cst_45 [1] : vector<16x32xf32> to vector<16xf32>
    %109 = vector.shape_cast %108 : vector<16xf32> to vector<16x1xf32>
    %110 = vector.broadcast %109 : vector<16x1xf32> to vector<16x32xf32>
    %111 = arith.cmpf oeq, %107, %110 : vector<16x32xf32>
    %cst_46 = arith.constant 3.200000e+01 : f32
    %112 = vector.broadcast %cst_46 : f32 to vector<16x32xf32>
    %113 = arith.select %111, %23, %112 : vector<16x32xi1>, vector<16x32xf32>
    %cst_47 = arith.constant dense<0x7F800000> : vector<16xf32>
    %114 = vector.multi_reduction <minimumf>, %113, %cst_47 [1] : vector<16x32xf32> to vector<16xf32>
    %115 = vector.shape_cast %114 : vector<16xf32> to vector<16x1xf32>
    %116 = vector.broadcast %115 : vector<16x1xf32> to vector<16x32xf32>
    %117 = arith.cmpf oeq, %23, %116 : vector<16x32xf32>
    %118 = arith.extui %117 : vector<16x32xi1> to vector<16x32xi32>
    %119 = arith.sitofp %118 : vector<16x32xi32> to vector<16x32xf32>
    %cst_48 = arith.constant 1.000000e+30 : f32
    %120 = vector.broadcast %cst_48 : f32 to vector<16x32xf32>
    %121 = arith.select %117, %120, %107 : vector<16x32xi1>, vector<16x32xf32>
    %cst_49 = arith.constant dense<0x7F800000> : vector<16xf32>
    %122 = vector.multi_reduction <minimumf>, %121, %cst_49 [1] : vector<16x32xf32> to vector<16xf32>
    %123 = vector.shape_cast %122 : vector<16xf32> to vector<16x1xf32>
    %124 = vector.broadcast %123 : vector<16x1xf32> to vector<16x32xf32>
    %125 = arith.cmpf oeq, %121, %124 : vector<16x32xf32>
    %cst_50 = arith.constant 3.200000e+01 : f32
    %126 = vector.broadcast %cst_50 : f32 to vector<16x32xf32>
    %127 = arith.select %125, %23, %126 : vector<16x32xi1>, vector<16x32xf32>
    %cst_51 = arith.constant dense<0x7F800000> : vector<16xf32>
    %128 = vector.multi_reduction <minimumf>, %127, %cst_51 [1] : vector<16x32xf32> to vector<16xf32>
    %129 = vector.shape_cast %128 : vector<16xf32> to vector<16x1xf32>
    %130 = vector.broadcast %129 : vector<16x1xf32> to vector<16x32xf32>
    %131 = arith.cmpf oeq, %23, %130 : vector<16x32xf32>
    %132 = arith.extui %131 : vector<16x32xi1> to vector<16x32xi32>
    %133 = arith.sitofp %132 : vector<16x32xi32> to vector<16x32xf32>
    %cst_52 = arith.constant 1.000000e+30 : f32
    %134 = vector.broadcast %cst_52 : f32 to vector<16x32xf32>
    %135 = arith.select %131, %134, %121 : vector<16x32xi1>, vector<16x32xf32>
    %cst_53 = arith.constant dense<0x7F800000> : vector<16xf32>
    %136 = vector.multi_reduction <minimumf>, %135, %cst_53 [1] : vector<16x32xf32> to vector<16xf32>
    %137 = vector.shape_cast %136 : vector<16xf32> to vector<16x1xf32>
    %138 = vector.broadcast %137 : vector<16x1xf32> to vector<16x32xf32>
    %139 = arith.cmpf oeq, %135, %138 : vector<16x32xf32>
    %cst_54 = arith.constant 3.200000e+01 : f32
    %140 = vector.broadcast %cst_54 : f32 to vector<16x32xf32>
    %141 = arith.select %139, %23, %140 : vector<16x32xi1>, vector<16x32xf32>
    %cst_55 = arith.constant dense<0x7F800000> : vector<16xf32>
    %142 = vector.multi_reduction <minimumf>, %141, %cst_55 [1] : vector<16x32xf32> to vector<16xf32>
    %143 = vector.shape_cast %142 : vector<16xf32> to vector<16x1xf32>
    %144 = vector.broadcast %143 : vector<16x1xf32> to vector<16x32xf32>
    %145 = arith.cmpf oeq, %23, %144 : vector<16x32xf32>
    %146 = arith.extui %145 : vector<16x32xi1> to vector<16x32xi32>
    %147 = arith.sitofp %146 : vector<16x32xi32> to vector<16x32xf32>
    %cst_56 = arith.constant 1.000000e+30 : f32
    %148 = vector.broadcast %cst_56 : f32 to vector<16x32xf32>
    %149 = arith.select %145, %148, %135 : vector<16x32xi1>, vector<16x32xf32>
    %cst_57 = arith.constant dense<0x7F800000> : vector<16xf32>
    %150 = vector.multi_reduction <minimumf>, %149, %cst_57 [1] : vector<16x32xf32> to vector<16xf32>
    %151 = vector.shape_cast %150 : vector<16xf32> to vector<16x1xf32>
    %152 = vector.broadcast %151 : vector<16x1xf32> to vector<16x32xf32>
    %153 = arith.cmpf oeq, %149, %152 : vector<16x32xf32>
    %cst_58 = arith.constant 3.200000e+01 : f32
    %154 = vector.broadcast %cst_58 : f32 to vector<16x32xf32>
    %155 = arith.select %153, %23, %154 : vector<16x32xi1>, vector<16x32xf32>
    %cst_59 = arith.constant dense<0x7F800000> : vector<16xf32>
    %156 = vector.multi_reduction <minimumf>, %155, %cst_59 [1] : vector<16x32xf32> to vector<16xf32>
    %157 = vector.shape_cast %156 : vector<16xf32> to vector<16x1xf32>
    %158 = vector.broadcast %157 : vector<16x1xf32> to vector<16x32xf32>
    %159 = arith.cmpf oeq, %23, %158 : vector<16x32xf32>
    %160 = arith.extui %159 : vector<16x32xi1> to vector<16x32xi32>
    %161 = arith.sitofp %160 : vector<16x32xi32> to vector<16x32xf32>
    %cst_60 = arith.constant 1.000000e+30 : f32
    %162 = vector.broadcast %cst_60 : f32 to vector<16x32xf32>
    %163 = arith.select %159, %162, %149 : vector<16x32xi1>, vector<16x32xf32>
    %cst_61 = arith.constant dense<0x7F800000> : vector<16xf32>
    %164 = vector.multi_reduction <minimumf>, %163, %cst_61 [1] : vector<16x32xf32> to vector<16xf32>
    %165 = vector.shape_cast %164 : vector<16xf32> to vector<16x1xf32>
    %166 = vector.broadcast %165 : vector<16x1xf32> to vector<16x32xf32>
    %167 = arith.cmpf oeq, %163, %166 : vector<16x32xf32>
    %cst_62 = arith.constant 3.200000e+01 : f32
    %168 = vector.broadcast %cst_62 : f32 to vector<16x32xf32>
    %169 = arith.select %167, %23, %168 : vector<16x32xi1>, vector<16x32xf32>
    %cst_63 = arith.constant dense<0x7F800000> : vector<16xf32>
    %170 = vector.multi_reduction <minimumf>, %169, %cst_63 [1] : vector<16x32xf32> to vector<16xf32>
    %171 = vector.shape_cast %170 : vector<16xf32> to vector<16x1xf32>
    %172 = vector.broadcast %171 : vector<16x1xf32> to vector<16x32xf32>
    %173 = arith.cmpf oeq, %23, %172 : vector<16x32xf32>
    %174 = arith.extui %173 : vector<16x32xi1> to vector<16x32xi32>
    %175 = arith.sitofp %174 : vector<16x32xi32> to vector<16x32xf32>
    %cst_64 = arith.constant 1.000000e+30 : f32
    %176 = vector.broadcast %cst_64 : f32 to vector<16x32xf32>
    %177 = arith.select %173, %176, %163 : vector<16x32xi1>, vector<16x32xf32>
    %cst_65 = arith.constant dense<0x7F800000> : vector<16xf32>
    %178 = vector.multi_reduction <minimumf>, %177, %cst_65 [1] : vector<16x32xf32> to vector<16xf32>
    %179 = vector.shape_cast %178 : vector<16xf32> to vector<16x1xf32>
    %180 = vector.broadcast %179 : vector<16x1xf32> to vector<16x32xf32>
    %181 = arith.cmpf oeq, %177, %180 : vector<16x32xf32>
    %cst_66 = arith.constant 3.200000e+01 : f32
    %182 = vector.broadcast %cst_66 : f32 to vector<16x32xf32>
    %183 = arith.select %181, %23, %182 : vector<16x32xi1>, vector<16x32xf32>
    %cst_67 = arith.constant dense<0x7F800000> : vector<16xf32>
    %184 = vector.multi_reduction <minimumf>, %183, %cst_67 [1] : vector<16x32xf32> to vector<16xf32>
    %185 = vector.shape_cast %184 : vector<16xf32> to vector<16x1xf32>
    %186 = vector.broadcast %185 : vector<16x1xf32> to vector<16x32xf32>
    %187 = arith.cmpf oeq, %23, %186 : vector<16x32xf32>
    %188 = arith.extui %187 : vector<16x32xi1> to vector<16x32xi32>
    %189 = arith.sitofp %188 : vector<16x32xi32> to vector<16x32xf32>
    %cst_68 = arith.constant 1.000000e+30 : f32
    %190 = vector.broadcast %cst_68 : f32 to vector<16x32xf32>
    %191 = arith.select %187, %190, %177 : vector<16x32xi1>, vector<16x32xf32>
    %cst_69 = arith.constant dense<0x7F800000> : vector<16xf32>
    %192 = vector.multi_reduction <minimumf>, %191, %cst_69 [1] : vector<16x32xf32> to vector<16xf32>
    %193 = vector.shape_cast %192 : vector<16xf32> to vector<16x1xf32>
    %194 = vector.broadcast %193 : vector<16x1xf32> to vector<16x32xf32>
    %195 = arith.cmpf oeq, %191, %194 : vector<16x32xf32>
    %cst_70 = arith.constant 3.200000e+01 : f32
    %196 = vector.broadcast %cst_70 : f32 to vector<16x32xf32>
    %197 = arith.select %195, %23, %196 : vector<16x32xi1>, vector<16x32xf32>
    %cst_71 = arith.constant dense<0x7F800000> : vector<16xf32>
    %198 = vector.multi_reduction <minimumf>, %197, %cst_71 [1] : vector<16x32xf32> to vector<16xf32>
    %199 = vector.shape_cast %198 : vector<16xf32> to vector<16x1xf32>
    %200 = vector.broadcast %199 : vector<16x1xf32> to vector<16x32xf32>
    %201 = arith.cmpf oeq, %23, %200 : vector<16x32xf32>
    %202 = arith.extui %201 : vector<16x32xi1> to vector<16x32xi32>
    %203 = arith.sitofp %202 : vector<16x32xi32> to vector<16x32xf32>
    %cst_72 = arith.constant 1.000000e+30 : f32
    %204 = vector.broadcast %cst_72 : f32 to vector<16x32xf32>
    %205 = arith.select %201, %204, %191 : vector<16x32xi1>, vector<16x32xf32>
    %cst_73 = arith.constant dense<0x7F800000> : vector<16xf32>
    %206 = vector.multi_reduction <minimumf>, %205, %cst_73 [1] : vector<16x32xf32> to vector<16xf32>
    %207 = vector.shape_cast %206 : vector<16xf32> to vector<16x1xf32>
    %208 = vector.broadcast %207 : vector<16x1xf32> to vector<16x32xf32>
    %209 = arith.cmpf oeq, %205, %208 : vector<16x32xf32>
    %cst_74 = arith.constant 3.200000e+01 : f32
    %210 = vector.broadcast %cst_74 : f32 to vector<16x32xf32>
    %211 = arith.select %209, %23, %210 : vector<16x32xi1>, vector<16x32xf32>
    %cst_75 = arith.constant dense<0x7F800000> : vector<16xf32>
    %212 = vector.multi_reduction <minimumf>, %211, %cst_75 [1] : vector<16x32xf32> to vector<16xf32>
    %213 = vector.shape_cast %212 : vector<16xf32> to vector<16x1xf32>
    %214 = vector.broadcast %213 : vector<16x1xf32> to vector<16x32xf32>
    %215 = arith.cmpf oeq, %23, %214 : vector<16x32xf32>
    %216 = arith.extui %215 : vector<16x32xi1> to vector<16x32xi32>
    %217 = arith.sitofp %216 : vector<16x32xi32> to vector<16x32xf32>
    %cst_76 = arith.constant 1.000000e+30 : f32
    %218 = vector.broadcast %cst_76 : f32 to vector<16x32xf32>
    %219 = arith.select %215, %218, %205 : vector<16x32xi1>, vector<16x32xf32>
    %cst_77 = arith.constant dense<0x7F800000> : vector<16xf32>
    %220 = vector.multi_reduction <minimumf>, %219, %cst_77 [1] : vector<16x32xf32> to vector<16xf32>
    %221 = vector.shape_cast %220 : vector<16xf32> to vector<16x1xf32>
    %222 = vector.broadcast %221 : vector<16x1xf32> to vector<16x32xf32>
    %223 = arith.cmpf oeq, %219, %222 : vector<16x32xf32>
    %cst_78 = arith.constant 3.200000e+01 : f32
    %224 = vector.broadcast %cst_78 : f32 to vector<16x32xf32>
    %225 = arith.select %223, %23, %224 : vector<16x32xi1>, vector<16x32xf32>
    %cst_79 = arith.constant dense<0x7F800000> : vector<16xf32>
    %226 = vector.multi_reduction <minimumf>, %225, %cst_79 [1] : vector<16x32xf32> to vector<16xf32>
    %227 = vector.shape_cast %226 : vector<16xf32> to vector<16x1xf32>
    %228 = vector.broadcast %227 : vector<16x1xf32> to vector<16x32xf32>
    %229 = arith.cmpf oeq, %23, %228 : vector<16x32xf32>
    %230 = arith.extui %229 : vector<16x32xi1> to vector<16x32xi32>
    %231 = arith.sitofp %230 : vector<16x32xi32> to vector<16x32xf32>
    %cst_80 = arith.constant 1.000000e+30 : f32
    %232 = vector.broadcast %cst_80 : f32 to vector<16x32xf32>
    %233 = arith.select %229, %232, %219 : vector<16x32xi1>, vector<16x32xf32>
    %cst_81 = arith.constant dense<0x7F800000> : vector<16xf32>
    %234 = vector.multi_reduction <minimumf>, %233, %cst_81 [1] : vector<16x32xf32> to vector<16xf32>
    %235 = vector.shape_cast %234 : vector<16xf32> to vector<16x1xf32>
    %236 = vector.broadcast %235 : vector<16x1xf32> to vector<16x32xf32>
    %237 = arith.cmpf oeq, %233, %236 : vector<16x32xf32>
    %cst_82 = arith.constant 3.200000e+01 : f32
    %238 = vector.broadcast %cst_82 : f32 to vector<16x32xf32>
    %239 = arith.select %237, %23, %238 : vector<16x32xi1>, vector<16x32xf32>
    %cst_83 = arith.constant dense<0x7F800000> : vector<16xf32>
    %240 = vector.multi_reduction <minimumf>, %239, %cst_83 [1] : vector<16x32xf32> to vector<16xf32>
    %241 = vector.shape_cast %240 : vector<16xf32> to vector<16x1xf32>
    %242 = vector.broadcast %241 : vector<16x1xf32> to vector<16x32xf32>
    %243 = arith.cmpf oeq, %23, %242 : vector<16x32xf32>
    %244 = arith.extui %243 : vector<16x32xi1> to vector<16x32xi32>
    %245 = arith.sitofp %244 : vector<16x32xi32> to vector<16x32xf32>
    %cst_84 = arith.constant 1.000000e+30 : f32
    %246 = vector.broadcast %cst_84 : f32 to vector<16x32xf32>
    %247 = arith.select %243, %246, %233 : vector<16x32xi1>, vector<16x32xf32>
    %cst_85 = arith.constant dense<0x7F800000> : vector<16xf32>
    %248 = vector.multi_reduction <minimumf>, %247, %cst_85 [1] : vector<16x32xf32> to vector<16xf32>
    %249 = vector.shape_cast %248 : vector<16xf32> to vector<16x1xf32>
    %250 = vector.broadcast %249 : vector<16x1xf32> to vector<16x32xf32>
    %251 = arith.cmpf oeq, %247, %250 : vector<16x32xf32>
    %cst_86 = arith.constant 3.200000e+01 : f32
    %252 = vector.broadcast %cst_86 : f32 to vector<16x32xf32>
    %253 = arith.select %251, %23, %252 : vector<16x32xi1>, vector<16x32xf32>
    %cst_87 = arith.constant dense<0x7F800000> : vector<16xf32>
    %254 = vector.multi_reduction <minimumf>, %253, %cst_87 [1] : vector<16x32xf32> to vector<16xf32>
    %255 = vector.shape_cast %254 : vector<16xf32> to vector<16x1xf32>
    %256 = vector.broadcast %255 : vector<16x1xf32> to vector<16x32xf32>
    %257 = arith.cmpf oeq, %23, %256 : vector<16x32xf32>
    %258 = arith.extui %257 : vector<16x32xi1> to vector<16x32xi32>
    %259 = arith.sitofp %258 : vector<16x32xi32> to vector<16x32xf32>
    %cst_88 = arith.constant 1.000000e+30 : f32
    %260 = vector.broadcast %cst_88 : f32 to vector<16x32xf32>
    %261 = arith.select %257, %260, %247 : vector<16x32xi1>, vector<16x32xf32>
    %cst_89 = arith.constant dense<0x7F800000> : vector<16xf32>
    %262 = vector.multi_reduction <minimumf>, %261, %cst_89 [1] : vector<16x32xf32> to vector<16xf32>
    %263 = vector.shape_cast %262 : vector<16xf32> to vector<16x1xf32>
    %264 = vector.broadcast %263 : vector<16x1xf32> to vector<16x32xf32>
    %265 = arith.cmpf oeq, %261, %264 : vector<16x32xf32>
    %cst_90 = arith.constant 3.200000e+01 : f32
    %266 = vector.broadcast %cst_90 : f32 to vector<16x32xf32>
    %267 = arith.select %265, %23, %266 : vector<16x32xi1>, vector<16x32xf32>
    %cst_91 = arith.constant dense<0x7F800000> : vector<16xf32>
    %268 = vector.multi_reduction <minimumf>, %267, %cst_91 [1] : vector<16x32xf32> to vector<16xf32>
    %269 = vector.shape_cast %268 : vector<16xf32> to vector<16x1xf32>
    %270 = vector.broadcast %269 : vector<16x1xf32> to vector<16x32xf32>
    %271 = arith.cmpf oeq, %23, %270 : vector<16x32xf32>
    %272 = arith.extui %271 : vector<16x32xi1> to vector<16x32xi32>
    %273 = arith.sitofp %272 : vector<16x32xi32> to vector<16x32xf32>
    %cst_92 = arith.constant 1.000000e+30 : f32
    %274 = vector.broadcast %cst_92 : f32 to vector<16x32xf32>
    %275 = arith.select %271, %274, %261 : vector<16x32xi1>, vector<16x32xf32>
    %cst_93 = arith.constant dense<0x7F800000> : vector<16xf32>
    %276 = vector.multi_reduction <minimumf>, %275, %cst_93 [1] : vector<16x32xf32> to vector<16xf32>
    %277 = vector.shape_cast %276 : vector<16xf32> to vector<16x1xf32>
    %278 = vector.broadcast %277 : vector<16x1xf32> to vector<16x32xf32>
    %279 = arith.cmpf oeq, %275, %278 : vector<16x32xf32>
    %cst_94 = arith.constant 3.200000e+01 : f32
    %280 = vector.broadcast %cst_94 : f32 to vector<16x32xf32>
    %281 = arith.select %279, %23, %280 : vector<16x32xi1>, vector<16x32xf32>
    %cst_95 = arith.constant dense<0x7F800000> : vector<16xf32>
    %282 = vector.multi_reduction <minimumf>, %281, %cst_95 [1] : vector<16x32xf32> to vector<16xf32>
    %283 = vector.shape_cast %282 : vector<16xf32> to vector<16x1xf32>
    %284 = vector.broadcast %283 : vector<16x1xf32> to vector<16x32xf32>
    %285 = arith.cmpf oeq, %23, %284 : vector<16x32xf32>
    %286 = arith.extui %285 : vector<16x32xi1> to vector<16x32xi32>
    %287 = arith.sitofp %286 : vector<16x32xi32> to vector<16x32xf32>
    %cst_96 = arith.constant 1.000000e+30 : f32
    %288 = vector.broadcast %cst_96 : f32 to vector<16x32xf32>
    %289 = arith.select %285, %288, %275 : vector<16x32xi1>, vector<16x32xf32>
    %cst_97 = arith.constant dense<0x7F800000> : vector<16xf32>
    %290 = vector.multi_reduction <minimumf>, %289, %cst_97 [1] : vector<16x32xf32> to vector<16xf32>
    %291 = vector.shape_cast %290 : vector<16xf32> to vector<16x1xf32>
    %292 = vector.broadcast %291 : vector<16x1xf32> to vector<16x32xf32>
    %293 = arith.cmpf oeq, %289, %292 : vector<16x32xf32>
    %cst_98 = arith.constant 3.200000e+01 : f32
    %294 = vector.broadcast %cst_98 : f32 to vector<16x32xf32>
    %295 = arith.select %293, %23, %294 : vector<16x32xi1>, vector<16x32xf32>
    %cst_99 = arith.constant dense<0x7F800000> : vector<16xf32>
    %296 = vector.multi_reduction <minimumf>, %295, %cst_99 [1] : vector<16x32xf32> to vector<16xf32>
    %297 = vector.shape_cast %296 : vector<16xf32> to vector<16x1xf32>
    %298 = vector.broadcast %297 : vector<16x1xf32> to vector<16x32xf32>
    %299 = arith.cmpf oeq, %23, %298 : vector<16x32xf32>
    %300 = arith.extui %299 : vector<16x32xi1> to vector<16x32xi32>
    %301 = arith.sitofp %300 : vector<16x32xi32> to vector<16x32xf32>
    %302 = tpu.concatenate %35, %49, %63, %77, %91, %105, %119, %133, %147, %161, %175, %189, %203, %217, %231, %245 in 0 : vector<16x32xf32>, vector<16x32xf32>, vector<16x32xf32>, vector<16x32xf32>, vector<16x32xf32>, vector<16x32xf32>, vector<16x32xf32>, vector<16x32xf32>, vector<16x32xf32>, vector<16x32xf32>, vector<16x32xf32>, vector<16x32xf32>, vector<16x32xf32>, vector<16x32xf32>, vector<16x32xf32>, vector<16x32xf32> -> vector<256x32xf32>
    %303 = tpu.concatenate %259, %273, %287, %301 in 0 : vector<16x32xf32>, vector<16x32xf32>, vector<16x32xf32>, vector<16x32xf32> -> vector<64x32xf32>
    %304 = tpu.concatenate %302, %303 in 0 : vector<256x32xf32>, vector<64x32xf32> -> vector<320x32xf32>
    %cst_100 = arith.constant dense<0.000000e+00> : vector<16x128xf32>
    %305 = tpu.matmul %6, %7, %cst_100 {dimension_numbers = #tpu.dot_dimension_numbers<[1], [0], [0], [1], [0, 0, 1, 1], [], []>} : vector<16x3xf32>, vector<3x128xf32>, vector<16x128xf32> -> vector<16x128xf32>
    %306 = vector.broadcast %9 : vector<1x128xf32> to vector<16x128xf32>
    %307 = arith.addf %305, %306 : vector<16x128xf32>
    %cst_101 = arith.constant dense<0.000000e+00> : vector<320x3xf32>
    %308 = tpu.matmul %304, %3, %cst_101 {dimension_numbers = #tpu.dot_dimension_numbers<[1], [0], [0], [1], [0, 0, 1, 1], [], []>} : vector<320x32xf32>, vector<32x3xf32>, vector<320x3xf32> -> vector<320x3xf32>
    %cst_102 = arith.constant dense<0.000000e+00> : vector<320x128xf32>
    %309 = tpu.matmul %308, %8, %cst_102 {dimension_numbers = #tpu.dot_dimension_numbers<[1], [0], [0], [1], [0, 0, 1, 1], [], []>} : vector<320x3xf32>, vector<3x128xf32>, vector<320x128xf32> -> vector<320x128xf32>
    %310 = vector.shape_cast %309 : vector<320x128xf32> to vector<20x16x128xf32>
    %311 = vector.shape_cast %307 : vector<16x128xf32> to vector<1x16x128xf32>
    %312 = vector.broadcast %311 : vector<1x16x128xf32> to vector<20x16x128xf32>
    %313 = arith.addf %310, %312 : vector<20x16x128xf32>
    %314 = vector.shape_cast %313 : vector<20x16x128xf32> to vector<320x128xf32>
    %cst_103 = arith.constant 0.000000e+00 : f32
    %315 = vector.broadcast %cst_103 : f32 to vector<320x128xf32>
    %316 = arith.maximumf %314, %315 : vector<320x128xf32>
    %cst_104 = arith.constant dense<0.000000e+00> : vector<320x128xf32>
    %317 = tpu.matmul %316, %10, %cst_104 {dimension_numbers = #tpu.dot_dimension_numbers<[1], [0], [0], [1], [0, 0, 1, 1], [], []>} : vector<320x128xf32>, vector<128x128xf32>, vector<320x128xf32> -> vector<320x128xf32>
    %318 = vector.broadcast %11 : vector<1x128xf32> to vector<320x128xf32>
    %319 = arith.addf %317, %318 : vector<320x128xf32>
    %cst_105 = arith.constant 0.000000e+00 : f32
    %320 = vector.broadcast %cst_105 : f32 to vector<320x128xf32>
    %321 = arith.maximumf %319, %320 : vector<320x128xf32>
    %cst_106 = arith.constant dense<0.000000e+00> : vector<320x128xf32>
    %322 = tpu.matmul %321, %12, %cst_106 {dimension_numbers = #tpu.dot_dimension_numbers<[1], [0], [0], [1], [0, 0, 1, 1], [], []>} : vector<320x128xf32>, vector<128x128xf32>, vector<320x128xf32> -> vector<320x128xf32>
    %323 = vector.broadcast %13 : vector<1x128xf32> to vector<320x128xf32>
    %324 = arith.addf %322, %323 : vector<320x128xf32>
    %cst_107 = arith.constant 0.000000e+00 : f32
    %325 = vector.broadcast %cst_107 : f32 to vector<320x128xf32>
    %326 = arith.maximumf %324, %325 : vector<320x128xf32>
    %327 = vector.shape_cast %326 : vector<320x128xf32> to vector<20x16x128xf32>
    %cst_108 = arith.constant dense<0xFF800000> : vector<16x128xf32>
    %328 = vector.multi_reduction <maximumf>, %327, %cst_108 [0] : vector<20x16x128xf32> to vector<16x128xf32>
    %c0_109 = arith.constant 0 : index
    %c0_110 = arith.constant 0 : index
    %c0_111 = arith.constant 0 : index
    %329 = vector.load %arg10[%c0_109, %c0_110, %c0_111] : memref<1x16x128xf32, #tpu.memory_space<vmem>>, vector<1x16x128xf32>
    %330 = vector.shape_cast %329 : vector<1x16x128xf32> to vector<16x128xf32>
    %331 = vector.shape_cast %328 : vector<16x128xf32> to vector<1x16x128xf32>
    tpu.vector_store %arg10[%c0_109, %c0_110, %c0_111], %331 {strides = array<i32>} : memref<1x16x128xf32, #tpu.memory_space<vmem>>, vector<1x16x128xf32>,
    return
  }
  func.func @transform_0(%arg0: i32, %arg1: i32) -> (i32, i32, i32) {
    %c0_i32 = arith.constant 0 : i32
    %c0_i32_0 = arith.constant 0 : i32
    %c0_i32_1 = arith.constant 0 : i32
    return %arg0, %c0_i32, %c0_i32_0 : i32, i32, i32
  }
  func.func @transform_1(%arg0: i32, %arg1: i32) -> (i32, i32) {
    %c0_i32 = arith.constant 0 : i32
    %c0_i32_0 = arith.constant 0 : i32
    %c0_i32_1 = arith.constant 0 : i32
    return %c0_i32, %c0_i32_0 : i32, i32
  }
  func.func @transform_2(%arg0: i32, %arg1: i32) -> (i32, i32) {
    %c0_i32 = arith.constant 0 : i32
    %c0_i32_0 = arith.constant 0 : i32
    %c0_i32_1 = arith.constant 0 : i32
    return %c0_i32, %c0_i32_0 : i32, i32
  }
  func.func @transform_3(%arg0: i32, %arg1: i32) -> (i32, i32) {
    %c0_i32 = arith.constant 0 : i32
    %c0_i32_0 = arith.constant 0 : i32
    %c0_i32_1 = arith.constant 0 : i32
    return %c0_i32, %c0_i32_0 : i32, i32
  }
  func.func @transform_4(%arg0: i32, %arg1: i32) -> (i32, i32) {
    %c0_i32 = arith.constant 0 : i32
    %c0_i32_0 = arith.constant 0 : i32
    %c0_i32_1 = arith.constant 0 : i32
    return %c0_i32, %c0_i32_0 : i32, i32
  }
  func.func @transform_5(%arg0: i32, %arg1: i32) -> (i32, i32) {
    %c0_i32 = arith.constant 0 : i32
    %c0_i32_0 = arith.constant 0 : i32
    %c0_i32_1 = arith.constant 0 : i32
    return %c0_i32, %c0_i32_0 : i32, i32
  }
  func.func @transform_6(%arg0: i32, %arg1: i32) -> (i32, i32) {
    %c0_i32 = arith.constant 0 : i32
    %c0_i32_0 = arith.constant 0 : i32
    %c0_i32_1 = arith.constant 0 : i32
    return %c0_i32, %c0_i32_0 : i32, i32
  }
  func.func @transform_7(%arg0: i32, %arg1: i32) -> (i32, i32) {
    %c0_i32 = arith.constant 0 : i32
    %c0_i32_0 = arith.constant 0 : i32
    %c0_i32_1 = arith.constant 0 : i32
    return %c0_i32, %c0_i32_0 : i32, i32
  }
  func.func @transform_8(%arg0: i32, %arg1: i32) -> (i32, i32, i32) {
    %c0_i32 = arith.constant 0 : i32
    %c0_i32_0 = arith.constant 0 : i32
    return %arg0, %arg1, %c0_i32 : i32, i32, i32
  }
}

</mosaic_0001>

<bundles_post_ra>
// kernel: tpu_custom_call.1
= control target key start
LH: loop header
LB: loop body
LE: loop exit
PB: predicated region body
PF: predicated region fallthrough
CT: control target
= control target key end

     0   :  { %13 = vsyncpa [#allocation3], 0  ;;  %s4467_s0 = inlined_call_operand.vmem [shape: f32[2,32,3], index: 0, kind: input, shape index: {}]   ;;  %s4468_s1 = inlined_call_operand.vmem [shape: f32[3,128], index: 1, kind: input, shape index: {}]   ;;  %s4469_s2 = inlined_call_operand.vmem [shape: f32[3,128], index: 2, kind: input, shape index: {}]   ;;  %s4470_s3 = inlined_call_operand.vmem [shape: f32[1,128], index: 3, kind: input, shape index: {}]   ;;  %s4471_s4 = inlined_call_operand.hbm [shape: f32[128,128], index: 4, kind: input, shape index: {}]   ;;  %s4472_s5 = inlined_call_operand.vmem [shape: f32[1,128], index: 5, kind: input, shape index: {}]   ;;  %s4473_s6 = inlined_call_operand.hbm [shape: f32[128,128], index: 6, kind: input, shape index: {}]   ;;  %s4474_s7 = inlined_call_operand.vmem [shape: f32[1,128], index: 7, kind: input, shape index: {}]   ;;  %s4475_s8 = inlined_call_operand.hbm [shape: f32[2,32,128], index: 8, kind: output, shape index: {}]  }
   0x1   :  { %14 = vsyncpa [#allocation6], 0 }
   0x2   :  { %15 = vsyncpa [#allocation4], 0 }
   0x3   :  { %17 = vsyncpa [#allocation4 + $0x1], 0  ;;  %s3801_s27 = smov 0   ;;  %s3803_s28 = smov 0  }
   0x4   :  { %s3805_s29 = smov 0   ;;  %s3807_s30 = smov 0  }
   0x5   :  { %s3809_s9 = smov 0   ;;  %s3811_s10 = smov 0  }
   0x6   :  { %s3813_s11 = smov 0   ;;  %s3815_s12 = smov 0  }
   0x7 LB: > { %4480 = sst [smem:[#allocation11_spill]] %s3736_s10  ;;  %s2783_s13 = sadd.s32 4294967295, %s3744_s12   ;;  %s3744_s12 = sphi %s3815_s12, %s23_s12   ;;  %s3740_s11 = sphi %s3813_s11, %s4492_s11   ;;  %s3736_s10 = sphi %s3811_s10, %s4491_s10   ;;  %s3732_s9 = sphi %s3809_s9, %s4490_s9   ;;  %s3728_s30 = sphi %s3807_s30, %s4489_s30   ;;  %s3724_s29 = sphi %s3805_s29, %s4495_s29   ;;  %s3720_s28 = sphi %s3803_s28, %s4494_s28   ;;  %s3716_s27 = sphi %s3801_s27, %s4493_s27  }
   0x8   : > { %4481 = sst [smem:[#allocation12_spill]] %s3740_s11  ;;  %s2784_s14 = sadd.s32 4294967294, %s3744_s12  }
   0x9   : > { %s32_s15 = sadd.s32 1, %s3736_s10  ;;  %s35_s16 = sadd.s32 1, %s3740_s11 }
   0xa   : > { %p33_p0 = scmp.ge.s32.totalorder %s32_s15, 2  ;;  %s217_s17 = sadd.s32 1, %s3724_s29 }
   0xb   : > { %p227_p1 = scmp.ne.s32.totalorder %s3724_s29, %s3720_s28  ;;  %p228_p2 = scmp.eq.s32.totalorder %s2783_s13, 3 }
   0xc   : > { %s4497_s15 = smov (%p33_p0, %s32_s15), 0  ;;  %s4499_s16 = smov (!%p33_p0, %s35_s16), %s3740_s11 }
   0xd   : > { %4482 = sst [smem:[#allocation13_spill]] %s4497_s15  ;;  %s213_s18 = ssub.s32 %s3736_s10, %s4497_s15 }
   0xe   : > { %p3853_p3 = por %p228_p2, %p227_p1  ;;  %p37_p4 = scmp.ge.s32.totalorder %s4499_s16, 2 }
   0xf   : > { %p233_p5 = scmp.ne.s32.totalorder %s3720_s28, %s3716_s27  ;;  %p234_p6 = scmp.eq.s32.totalorder %s2784_s14, 3 }
  0x10   : > { %p2785_p7 = scmp.ge.s32.totalorder %s3744_s12, 1  ;;  %s4501_s16 = smov (%p37_p4, %s4499_s16), 0 }
  0x11   : > { %4484 = sst [smem:[#allocation14_spill]] %s4501_s16  ;;  %p3862_p8 = por %p234_p6, %p233_p5 }
  0x12   : > { %p241_p9 = scmp.lt.s32.totalorder %s3744_s12, 5  ;;  %s212_s21 = ssub.s32 %s3740_s11, %s4501_s16 }
  0x13   : > { %s214_s22 = sor.u32 %s213_s18, %s212_s21  ;;  %p3873_p12 = scmp.eq.s32.totalorder %s2783_s13, 0 }
  0x14   : > { %p3869_p10 = pnand %p2785_p7, %p241_p9  ;;  %p215_p11 = scmp.eq.s32.totalorder %s214_s22, 0 }
  0x15   : > { %s3746_s26 = smov [#allocation2]  }
  0x16   : > { %p3503_p13 = pneg %p3869_p10  ;;  %s262_s14 = sshll.u32 %s3746_s26, 4  ;;  %s263_s14 = int_to_ptr.vmem [resolvable:$true] %s262_s14 }
  0x17   : > { %s3880_s25 = scalar_select %p215_p11, %s3724_s29, %s217_s17  }
  0x18   : > { %p3884_p0 = pnand %p3873_p12, %p3503_p13  ;;  %s3603_s13 = scalar_lea.vmem %s263_s14, 2048 }
  0x19   : > { %p3604_p2 = scmp.ne.s32.totalorder %s263_s14, %s3603_s13  ;;  %p3611_p6 = scmp.lt.s32.totalorder %s263_s14, %s263_s14 }
  0x1a   : > { %p3594_p1 = pneg %p3884_p0  ;;  %p3612_p7 = scmp.lt.s32.totalorder %s3603_s13, %s3603_s13 }
  0x1c   : > { %p3606_p4 = pnand %p3604_p2, %p3594_p1  ;;  %p3613_p9 = por %p3612_p7, %p3611_p6 }
  0x1e   : > { %p3607_p5 = pneg %p3606_p4 }
  0x20   : > { %p3614_p11 = pnand %p3613_p9, %p3607_p5 }
  0x22   : > { %3617 = shalt.err (!%p3614_p11)
}
  0x23   : > { %s3747_s17 = smov 128   ;;  %s3748_s21 = smov 8  }
  0x24   : > { %3506 = dma.hbm_to_vmem [thread:$0]  (!%p3884_p0), %s4471_s4, 2048, %s263_s14, [#allocation3], %s3747_s17, %s3747_s17, %s3748_s21  }
  0x25   : > { %s3749_s16 = smov [#allocation5]  }
  0x26   : > { %s278_s15 = sshll.u32 %s3749_s16, 4  ;;  %s279_s15 = int_to_ptr.vmem [resolvable:$true] %s278_s15 }
  0x27   : > { %s3629_s11 = scalar_lea.vmem %s279_s15, 2048  ;;  %p3637_p5 = scmp.lt.s32.totalorder %s279_s15, %s279_s15 }
  0x28   : > { %p3630_p13 = scmp.ne.s32.totalorder %s279_s15, %s3629_s11  ;;  %p3638_p6 = scmp.lt.s32.totalorder %s3629_s11, %s3629_s11 }
  0x2a   : > { %p3632_p2 = pnand %p3630_p13, %p3594_p1  ;;  %p3639_p7 = por %p3638_p6, %p3637_p5 }
  0x2c   : > { %p3633_p4 = pneg %p3632_p2 }
  0x2e   : > { %p3640_p9 = pnand %p3639_p7, %p3633_p4 }
  0x30   : > { %3643 = shalt.err (!%p3640_p9)
}
  0x31   : > { %3509 = dma.hbm_to_vmem [thread:$0]  (!%p3884_p0), %s4473_s6, 2048, %s279_s15, [#allocation6], %s3747_s17, %s3747_s17, %s3748_s21  }
  0x32   : > { %305 = sbr.rel (%p3869_p10) target bundleno = 6737 (0x1a51), region = 52 }
  0x37   : > { %3703 = dma.done.wait (%p3873_p12), [#allocation3], 2048  }
  0x38   : > { %3705 = vsyncadd (%p3873_p12), [#allocation3], 4294965248 }
  0x39   : > { %3707 = dma.done.wait (%p3873_p12), [#allocation6], 2048  }
  0x3a   : > { %3709 = vsyncadd (%p3873_p12), [#allocation6], 4294965248  ;;  %p343_p1 = scmp.lt.s32.totalorder %s3732_s9, 1  ;;  %v3750_v0 = vmov 0.0   ;;  %vm3751_vm0 = vmmov 0   ;;  %s2795_s11 = sshll.u32 %s3728_s30, 4  ;;  %v579_v12 = vlaneseq }
  0x3b   : > { %3152 = vmatprep.subr.mxu0 %v3750_v0  ;;  %3160 = vmatprep.mubr.msk.f32.mxu0 %vm3751_vm0, %v3750_v0  ;;  %vm398_vm1 = vcmask 23552   ;;  %v3752_v11 = vmov 1.0   ;;  %vm588_vm2 = vcmask 261120   ;;  %v357_v42 = vld [vmem:[%s4468_s1] sm:$0x7]  ;;  %vm1073_vm7 = vcmask 1042432  }
  0x3c   : > { %s344_s10 = scalar_select %p343_p1, %s3732_s9, 1  ;;  %v580_v13 = vshrl.u32 %v579_v12, 7  ;;  %v586_v26 = vand.u32 127, %v579_v12  ;;  %v358_v43 = vld [vmem:[%s4469_s2] sm:$0x7] }
  0x3d   : > { %s340_s23 = sand.u32 1, %s3720_s28   ;;  %s2936_s18 = sshll.u32 %s3732_s9, 2 }
  0x3e   : > { %s2940_s15 = sshll.u32 %s344_s10, 5  ;;  %v581_v14 = vsub.s32 0, %v580_v13  ;;  %v3945_v27 = vcvt.s32.f32 %v586_v26  ;;  %s4416_s10 = scalar_lea.sflag [#allocation4], %s340_s23 }
  0x3f   : > { %s347_s14 = scalar_lea.vmem %s4467_s0, %s2940_s15  ;;  %s3753_s15 = smov [#allocation7]  }
  0x40   : > { %s354_s24 = scalar_lea.vmem %s347_s14, %s2795_s11  ;;  %v353_v1 = vld [vmem:[%s347_s14 + $0x18] sm:$0xff]  ;;  %v352_v2 = vld [vmem:[%s347_s14 + $0x10] sm:$0xff]  ;;  %v351_v6 = vld [vmem:[%s347_s14 + $0x8] sm:$0xff]  ;;  %s3648_s16 = sshll.u32 %s3753_s15, 4  ;;  %s3649_s16 = int_to_ptr.vmem [resolvable:$false] %s3648_s16 }
  0x41   : > { %3163 = vmatprep.subr.msk.mxu1 %vm398_vm1, %v353_v1  ;;  %v397_v3 = vmul.f32 %v353_v1, %v353_v1  ;;  %v355_v4 = vld [vmem:[%s354_s24] sm:$0xff]  ;;  %v396_v5 = vmul.f32 %v352_v2, %v352_v2  ;;  %v395_v7 = vmul.f32 %v351_v6, %v351_v6  ;;  %v356_v10 = vld [vmem:[%s354_s24 + $0x8] sm:$0xff]  ;;  %s2935_s24 = sshll.u32 %s3728_s30, 1 }
  0x42   : > { %3164 = vmatpush3.xpose.msk.msra.mxu1 %vm398_vm1, %v353_v1  ;;  %3171 = vmatprep.mubr.msk.f32.mxu1 %vm398_vm1, %v355_v4  ;;  %v350_v8 = vld [vmem:[%s347_s14] sm:$0xff]  ;;  %s2792_s14 = sshll.u32 %s340_s23, 4  ;;  %s2680_s17 = sadd.s32 %s2936_s18, %s2935_s24 }
  0x43   : > { %3153 = vmatpush3.xpose.msk.msra.mxu0 %vm398_vm1, %v397_v3  ;;  %3165 = vmatprep.subr.msk.mxu1 %vm398_vm1, %v352_v2  ;;  %v394_v9 = vmul.f32 %v350_v8, %v350_v8  ;;  %s342_s30 = scalar_lea.vmem [#allocation7], %s2792_s14  ;;  %s2937_s21 = sshll.u32 %s2680_s17, 7 }
  0x44   : > { %3154 = vmatprep.subr.mxu0 %v3750_v0  ;;  %s2683_s9 = sshll.u32 %s342_s30, 4  ;;  %s4412_s13 = scalar_lea.hbm %s4475_s8, %s2937_s21  ;;  %s4407_s9 = int_to_ptr.vmem [resolvable:$true] %s2683_s9 }
  0x45   : > { %s3644_s11 = scalar_lea.vmem %s4407_s9, 256  ;;  %s3650_s14 = scalar_lea.vmem %s3649_s16, 512 }
  0x46   : > { %3166 = vmatpush3.xpose.msk.msra.mxu1 %vm398_vm1, %v352_v2  ;;  %p3645_p10 = scmp.ne.s32.totalorder %s4407_s9, %s3644_s11  ;;  %p3651_p11 = scmp.lt.s32.totalorder %s4407_s9, %s3649_s16 }
  0x47   : > { %3155 = vmatpush3.xpose.msk.msra.mxu0 %vm398_vm1, %v396_v5  ;;  %3167 = vmatprep.subr.msk.mxu1 %vm398_vm1, %v351_v6  ;;  %p3652_p13 = scmp.lt.s32.totalorder %s3650_s14, %s3644_s11 }
  0x48   : > { %3156 = vmatprep.subr.mxu0 %v3750_v0  ;;  %p3646_p12 = pnand %p3645_p10, %p3853_p3 }
  0x49   : > { %p3653_p2 = por %p3652_p13, %p3651_p11 }
  0x4a   : > { %3168 = vmatpush3.xpose.msk.msra.mxu1 %vm398_vm1, %v351_v6  ;;  %p3647_p0 = pneg %p3646_p12 }
  0x4b   : > { %3157 = vmatpush3.xpose.msk.msra.mxu0 %vm398_vm1, %v395_v7  ;;  %3169 = vmatprep.subr.msk.mxu1 %vm398_vm1, %v350_v8 }
  0x4c   : > { %3158 = vmatprep.subr.mxu0 %v3750_v0  ;;  %p3654_p4 = pnand %p3653_p2, %p3647_p0 }
  0x4e   : > { %3170 = vmatpush3.xpose.msk.msra.mxu1 %vm398_vm1, %v350_v8 }
  0x4f   : > { %3159 = vmatpush3.xpose.msk.msra.mxu0 %vm398_vm1, %v394_v9  ;;  %3179 = vmatprep.subr.mxu1 %v353_v1 }
  0x50   : > { %3174 = vmatprep.subr.msk.mxu0 %vm1073_vm7, %v357_v42 }
  0x51   : > { %3172 = vmatmul.mubr.msk.f32.vlgmr.msra.gmra.mxu1 %vm398_vm1, %v356_v10 }
  0x52   : > { %3161 = vmatmul.mubr.msk.f32.vlgmr.msra.gmra.mxu0 %vm398_vm1, %v3752_v11  ;;  %3180 = vmatpush3.msra.mxu1 %v353_v1 }
  0x53   : > { %3181 = vmatprep.subr.mxu1 %v352_v2  ;;  %3176 = vmatprep.mubr.msk.f32.mxu0 %vm398_vm1, %v355_v4 }
  0x54   : > { %3182 = vmatpush3.msra.mxu1 %v352_v2  ;;  %3175 = vmatpush3.msk.msra.mxu0 %vm1073_vm7, %v357_v42 }
  0x55   : > { %3183 = vmatprep.subr.mxu1 %v351_v6  ;;  %3247 = vmatprep.subr.msk.mxu0 %vm1073_vm7, %v358_v43 }
  0x56   : > { %3184 = vmatpush3.msra.mxu1 %v351_v6  ;;  %3177 = vmatmul.mubr.msk.f32.vlgmr.msra.gmra.mxu0 %vm398_vm1, %v356_v10 }
  0x57   : > { %3185 = vmatprep.subr.mxu1 %v350_v8  ;;  %3248 = vmatpush3.msk.msra.mxu0 %vm1073_vm7, %v358_v43 }
  0x58   : > { %3186 = vmatpush3.msra.mxu1 %v350_v8 }
 0x111   : > { %v3173_v15 = vpop.f32.mrf.mxu1 }
 0x112   : > { %v480_v16 = vpop.f32.mrf.mxu0  ;;  %v578_v19 = vmul.f32 2.0, %v3173_v15 }
 0x113   : > { %v582_v17 = vrot.slane %v480_v16, %v581_v14  ;;  %v568_v18 = vpop.f32.mrf.mxu1 }
 0x114   : > { %v577_v20 = vmul.f32 2.0, %v568_v18  ;;  %v3162_v21 = vpop.f32.mrf.mxu0 }
 0x115   : > { %v584_v23 = vsub.f32 %v582_v17, %v578_v19 }
 0x116   : > { %v583_v22 = vsub.f32 %v582_v17, %v577_v20 }
 0x117   : > { %v592_v25 = vsel %vm588_vm2, %v584_v23, inf }
 0x118   : > { %v589_v24 = vsel %vm588_vm2, %v583_v22, inf }
 0x119   : > { %590 = vmin.xlane.f32.xlu0 %v589_v24 }
 0x11d   : > { %593 = vmin.xlane.f32.xlu0 %v592_v25 }
 0x1a2   : > { %v591_v28 = vpop.xlane.xlu0 %590 }
 0x1a3   : > { %vm595_vm3 = vcmp.eq.f32.partialorder %v583_v22, %v591_v28 }
 0x1a4   : > { %v597_v29 = vsel %vm595_vm3, %v3945_v27, 32.0 }
 0x1a5   : > { %v599_v30 = vsel %vm588_vm2, %v597_v29, inf }
 0x1a6   : > { %600 = vmin.xlane.f32.xlu1 %v599_v30  ;;  %v594_v31 = vpop.xlane.xlu0 %593 }
 0x1a7   : > { %vm596_vm4 = vcmp.eq.f32.partialorder %v584_v23, %v594_v31 }
 0x1a8   : > { %v598_v32 = vsel %vm596_vm4, %v3945_v27, 32.0 }
 0x1a9   : > { %v602_v33 = vsel %vm588_vm2, %v598_v32, inf }
 0x1aa   : > { %603 = vmin.xlane.f32.xlu1 %v602_v33 }
 0x22f   : > { %v601_v34 = vpop.xlane.xlu1 %600 }
 0x230   : > { %vm605_vm5 = vcmp.eq.f32.partialorder %v3945_v27, %v601_v34 }
 0x231   : > { %v2807_v35 = vsel %vm605_vm5, 1.0, %v3750_v0  ;;  %v611_v36 = vsel %vm605_vm5, 1e+30, %v583_v22 }
 0x232   : > { %3187 = vmatprep.mubr.msk.f32.mxu1 %vm588_vm2, %v2807_v35  ;;  %v613_v37 = vsel %vm588_vm2, %v611_v36, inf }
 0x233   : > { %614 = vmin.xlane.f32.xlu0 %v613_v37  ;;  %v604_v38 = vpop.xlane.xlu1 %603 }
 0x234   : > { %vm606_vm6 = vcmp.eq.f32.partialorder %v3945_v27, %v604_v38 }
 0x235   : > { %v2808_v39 = vsel %vm606_vm6, 1.0, %v3750_v0  ;;  %v612_v40 = vsel %vm606_vm6, 1e+30, %v584_v23 }
 0x236   : > { %3188 = vmatmul.mubr.msk.f32.vlgmr.msra.gmra.mxu1 %vm588_vm2, %v2808_v39  ;;  %v616_v41 = vsel %vm588_vm2, %v612_v40, inf }
 0x237   : > { %617 = vmin.xlane.f32.xlu1 %v616_v41 }
 0x2bc   : > { %v615_v44 = vpop.xlane.xlu0 %614 }
 0x2bd   : > { %vm619_vm8 = vcmp.eq.f32.partialorder %v611_v36, %v615_v44 }
 0x2be   : > { %v621_v45 = vsel %vm619_vm8, %v3945_v27, 32.0 }
 0x2bf   : > { %v623_v46 = vsel %vm588_vm2, %v621_v45, inf }
 0x2c0   : > { %v618_v47 = vpop.xlane.xlu1 %617  ;;  %624 = vmin.xlane.f32.xlu0 %v623_v46 }
 0x2c1   : > { %vm620_vm9 = vcmp.eq.f32.partialorder %v612_v40, %v618_v47 }
 0x2c2   : > { %v622_v48 = vsel %vm620_vm9, %v3945_v27, 32.0 }
 0x2c3   : > { %v626_v49 = vsel %vm588_vm2, %v622_v48, inf }
 0x2c4   : > { %627 = vmin.xlane.f32.xlu1 %v626_v49 }
 0x2f6   : > { %v3189_v50 = vpop.f32.mrf.mxu1 }
 0x2f8   : > { %v1338_v51 = vpop.f32.mrf.mxu1 }
 0x2f9   : > { %3249 = vmatprep.mubr.msk.f32.mxu0 %vm398_vm1, %v1338_v51 }
 0x2fa   : > { %3250 = vmatmul.mubr.msk.f32.vlgmr.msra.gmra.mxu0 %vm398_vm1, %v3189_v50 }
 0x349   : > { %v625_v52 = vpop.xlane.xlu0 %624 }
 0x34a   : > { %vm629_vm10 = vcmp.eq.f32.partialorder %v3945_v27, %v625_v52 }
 0x34b   : > { %v2809_v53 = vsel %vm629_vm10, 1.0, %v3750_v0  ;;  %v635_v54 = vsel %vm629_vm10, 1e+30, %v611_v36 }
 0x34c   : > { %3190 = vmatprep.mubr.msk.f32.mxu1 %vm588_vm2, %v2809_v53  ;;  %v637_v55 = vsel %vm588_vm2, %v635_v54, inf }
 0x34d   : > { %v628_v56 = vpop.xlane.xlu1 %627  ;;  %638 = vmin.xlane.f32.xlu0 %v637_v55 }
 0x34e   : > { %vm630_vm11 = vcmp.eq.f32.partialorder %v3945_v27, %v628_v56 }
 0x34f   : > { %v2810_v57 = vsel %vm630_vm11, 1.0, %v3750_v0  ;;  %v636_v58 = vsel %vm630_vm11, 1e+30, %v612_v40 }
 0x350   : > { %3191 = vmatmul.mubr.msk.f32.gmra.mxu1 %vm588_vm2, %v2810_v57  ;;  %v640_v59 = vsel %vm588_vm2, %v636_v58, inf }
 0x351   : > { %641 = vmin.xlane.f32.xlu1 %v640_v59 }
 0x3d6   : > { %v639_v60 = vpop.xlane.xlu0 %638 }
 0x3d7   : > { %vm643_vm12 = vcmp.eq.f32.partialorder %v635_v54, %v639_v60 }
 0x3d8   : > { %v645_v61 = vsel %vm643_vm12, %v3945_v27, 32.0 }
 0x3d9   : > { %v647_v62 = vsel %vm588_vm2, %v645_v61, inf }
 0x3da   : > { %v642_v63 = vpop.xlane.xlu1 %641  ;;  %648 = vmin.xlane.f32.xlu0 %v647_v62 }
 0x3db   : > { %vm644_vm13 = vcmp.eq.f32.partialorder %v636_v58, %v642_v63 }
 0x3dc   : > { %v646_v1 = vsel %vm644_vm13, %v3945_v27, 32.0 }
 0x3dd   : > { %v650_v2 = vsel %vm588_vm2, %v646_v1, inf }
 0x3de   : > { %651 = vmin.xlane.f32.xlu1 %v650_v2 }
 0x410   : > { %v3192_v3 = vpop.f32.mrf.mxu1 }
 0x412   : > { %v1348_v4 = vpop.f32.mrf.mxu1 }
 0x413   : > { %3252 = vmatprep.mubr.msk.f32.mxu0 %vm398_vm1, %v1348_v4 }
 0x414   : > { %3253 = vmatmul.mubr.msk.f32.gmra.mxu0 %vm398_vm1, %v3192_v3 }
 0x463   : > { %v649_v5 = vpop.xlane.xlu0 %648 }
 0x464   : > { %vm653_vm14 = vcmp.eq.f32.partialorder %v3945_v27, %v649_v5 }
 0x465   : > { %v2811_v6 = vsel %vm653_vm14, 1.0, %v3750_v0  ;;  %v659_v7 = vsel %vm653_vm14, 1e+30, %v635_v54 }
 0x466   : > { %3193 = vmatprep.mubr.msk.f32.mxu1 %vm588_vm2, %v2811_v6  ;;  %v661_v8 = vsel %vm588_vm2, %v659_v7, inf }
 0x467   : > { %v652_v9 = vpop.xlane.xlu1 %651  ;;  %662 = vmin.xlane.f32.xlu0 %v661_v8 }
 0x468   : > { %vm654_vm15 = vcmp.eq.f32.partialorder %v3945_v27, %v652_v9 }
 0x469   : > { %v2812_v10 = vsel %vm654_vm15, 1.0, %v3750_v0  ;;  %v660_v11 = vsel %vm654_vm15, 1e+30, %v636_v58 }
 0x46a   : > { %3194 = vmatmul.mubr.msk.f32.gmra.mxu1 %vm588_vm2, %v2812_v10  ;;  %v664_v12 = vsel %vm588_vm2, %v660_v11, inf }
 0x46b   : > { %665 = vmin.xlane.f32.xlu1 %v664_v12 }
 0x4f0   : > { %v663_v13 = vpop.xlane.xlu0 %662 }
 0x4f1   : > { %vm667_vm0 = vcmp.eq.f32.partialorder %v659_v7, %v663_v13 }
 0x4f2   : > { %v669_v14 = vsel %vm667_vm0, %v3945_v27, 32.0 }
 0x4f3   : > { %v671_v15 = vsel %vm588_vm2, %v669_v14, inf }
 0x4f4   : > { %v666_v16 = vpop.xlane.xlu1 %665  ;;  %672 = vmin.xlane.f32.xlu0 %v671_v15 }
 0x4f5   : > { %vm668_vm3 = vcmp.eq.f32.partialorder %v660_v11, %v666_v16 }
 0x4f6   : > { %v670_v17 = vsel %vm668_vm3, %v3945_v27, 32.0 }
 0x4f7   : > { %v674_v18 = vsel %vm588_vm2, %v670_v17, inf }
 0x4f8   : > { %675 = vmin.xlane.f32.xlu1 %v674_v18 }
 0x52a   : > { %v3195_v19 = vpop.f32.mrf.mxu1 }
 0x52c   : > { %v1358_v20 = vpop.f32.mrf.mxu1 }
 0x52d   : > { %3255 = vmatprep.mubr.msk.f32.mxu0 %vm398_vm1, %v1358_v20 }
 0x52e   : > { %3256 = vmatmul.mubr.msk.f32.gmra.mxu0 %vm398_vm1, %v3195_v19 }
 0x57d   : > { %v673_v21 = vpop.xlane.xlu0 %672 }
 0x57e   : > { %vm677_vm4 = vcmp.eq.f32.partialorder %v3945_v27, %v673_v21 }
 0x57f   : > { %v2813_v22 = vsel %vm677_vm4, 1.0, %v3750_v0  ;;  %v683_v23 = vsel %vm677_vm4, 1e+30, %v659_v7 }
 0x580   : > { %3196 = vmatprep.mubr.msk.f32.mxu1 %vm588_vm2, %v2813_v22  ;;  %v685_v24 = vsel %vm588_vm2, %v683_v23, inf }
 0x581   : > { %v676_v25 = vpop.xlane.xlu1 %675  ;;  %686 = vmin.xlane.f32.xlu0 %v685_v24 }
 0x582   : > { %vm678_vm5 = vcmp.eq.f32.partialorder %v3945_v27, %v676_v25 }
 0x583   : > { %v2814_v26 = vsel %vm678_vm5, 1.0, %v3750_v0  ;;  %v684_v28 = vsel %vm678_vm5, 1e+30, %v660_v11 }
 0x584   : > { %3197 = vmatmul.mubr.msk.f32.gmra.mxu1 %vm588_vm2, %v2814_v26  ;;  %v688_v29 = vsel %vm588_vm2, %v684_v28, inf }
 0x585   : > { %689 = vmin.xlane.f32.xlu1 %v688_v29 }
 0x60a   : > { %v687_v30 = vpop.xlane.xlu0 %686 }
 0x60b   : > { %vm691_vm6 = vcmp.eq.f32.partialorder %v683_v23, %v687_v30 }
 0x60c   : > { %v693_v31 = vsel %vm691_vm6, %v3945_v27, 32.0 }
 0x60d   : > { %v695_v32 = vsel %vm588_vm2, %v693_v31, inf }
 0x60e   : > { %v690_v33 = vpop.xlane.xlu1 %689  ;;  %696 = vmin.xlane.f32.xlu0 %v695_v32 }
 0x60f   : > { %vm692_vm7 = vcmp.eq.f32.partialorder %v684_v28, %v690_v33 }
 0x610   : > { %v694_v34 = vsel %vm692_vm7, %v3945_v27, 32.0 }
 0x611   : > { %v698_v35 = vsel %vm588_vm2, %v694_v34, inf }
 0x612   : > { %699 = vmin.xlane.f32.xlu1 %v698_v35 }
 0x644   : > { %v3198_v36 = vpop.f32.mrf.mxu1 }
 0x646   : > { %v1368_v37 = vpop.f32.mrf.mxu1 }
 0x647   : > { %3258 = vmatprep.mubr.msk.f32.mxu0 %vm398_vm1, %v1368_v37 }
 0x648   : > { %3259 = vmatmul.mubr.msk.f32.gmra.mxu0 %vm398_vm1, %v3198_v36 }
 0x697   : > { %v697_v38 = vpop.xlane.xlu0 %696 }
 0x698   : > { %vm701_vm8 = vcmp.eq.f32.partialorder %v3945_v27, %v697_v38 }
 0x699   : > { %v2815_v39 = vsel %vm701_vm8, 1.0, %v3750_v0  ;;  %v707_v40 = vsel %vm701_vm8, 1e+30, %v683_v23 }
 0x69a   : > { %3199 = vmatprep.mubr.msk.f32.mxu1 %vm588_vm2, %v2815_v39  ;;  %v709_v41 = vsel %vm588_vm2, %v707_v40, inf }
 0x69b   : > { %v700_v42 = vpop.xlane.xlu1 %699  ;;  %710 = vmin.xlane.f32.xlu0 %v709_v41 }
 0x69c   : > { %vm702_vm9 = vcmp.eq.f32.partialorder %v3945_v27, %v700_v42 }
 0x69d   : > { %v2816_v43 = vsel %vm702_vm9, 1.0, %v3750_v0  ;;  %v708_v44 = vsel %vm702_vm9, 1e+30, %v684_v28 }
 0x69e   : > { %3200 = vmatmul.mubr.msk.f32.gmra.mxu1 %vm588_vm2, %v2816_v43  ;;  %v712_v45 = vsel %vm588_vm2, %v708_v44, inf }
 0x69f   : > { %713 = vmin.xlane.f32.xlu1 %v712_v45 }
 0x724   : > { %v711_v46 = vpop.xlane.xlu0 %710 }
 0x725   : > { %vm715_vm10 = vcmp.eq.f32.partialorder %v707_v40, %v711_v46 }
 0x726   : > { %v717_v47 = vsel %vm715_vm10, %v3945_v27, 32.0 }
 0x727   : > { %v719_v48 = vsel %vm588_vm2, %v717_v47, inf }
 0x728   : > { %v714_v49 = vpop.xlane.xlu1 %713  ;;  %720 = vmin.xlane.f32.xlu0 %v719_v48 }
 0x729   : > { %vm716_vm11 = vcmp.eq.f32.partialorder %v708_v44, %v714_v49 }
 0x72a   : > { %v718_v50 = vsel %vm716_vm11, %v3945_v27, 32.0 }
 0x72b   : > { %v722_v51 = vsel %vm588_vm2, %v718_v50, inf }
 0x72c   : > { %723 = vmin.xlane.f32.xlu1 %v722_v51 }
 0x75e   : > { %v3201_v52 = vpop.f32.mrf.mxu1 }
 0x760   : > { %v1378_v53 = vpop.f32.mrf.mxu1 }
 0x761   : > { %3261 = vmatprep.mubr.msk.f32.mxu0 %vm398_vm1, %v1378_v53 }
 0x762   : > { %3262 = vmatmul.mubr.msk.f32.gmra.mxu0 %vm398_vm1, %v3201_v52 }
 0x7b1   : > { %v721_v54 = vpop.xlane.xlu0 %720 }
 0x7b2   : > { %vm725_vm12 = vcmp.eq.f32.partialorder %v3945_v27, %v721_v54 }
 0x7b3   : > { %v2817_v55 = vsel %vm725_vm12, 1.0, %v3750_v0  ;;  %v731_v56 = vsel %vm725_vm12, 1e+30, %v707_v40 }
 0x7b4   : > { %3202 = vmatprep.mubr.msk.f32.mxu1 %vm588_vm2, %v2817_v55  ;;  %v733_v57 = vsel %vm588_vm2, %v731_v56, inf }
 0x7b5   : > { %v724_v58 = vpop.xlane.xlu1 %723  ;;  %734 = vmin.xlane.f32.xlu0 %v733_v57 }
 0x7b6   : > { %vm726_vm13 = vcmp.eq.f32.partialorder %v3945_v27, %v724_v58 }
 0x7b7   : > { %v2818_v59 = vsel %vm726_vm13, 1.0, %v3750_v0  ;;  %v732_v60 = vsel %vm726_vm13, 1e+30, %v708_v44 }
 0x7b8   : > { %3203 = vmatmul.mubr.msk.f32.gmra.mxu1 %vm588_vm2, %v2818_v59  ;;  %v736_v61 = vsel %vm588_vm2, %v732_v60, inf }
 0x7b9   : > { %737 = vmin.xlane.f32.xlu1 %v736_v61 }
 0x83e   : > { %v735_v62 = vpop.xlane.xlu0 %734 }
 0x83f   : > { %vm739_vm14 = vcmp.eq.f32.partialorder %v731_v56, %v735_v62 }
 0x840   : > { %v741_v63 = vsel %vm739_vm14, %v3945_v27, 32.0 }
 0x841   : > { %v743_v1 = vsel %vm588_vm2, %v741_v63, inf }
 0x842   : > { %v738_v2 = vpop.xlane.xlu1 %737  ;;  %744 = vmin.xlane.f32.xlu0 %v743_v1 }
 0x843   : > { %vm740_vm15 = vcmp.eq.f32.partialorder %v732_v60, %v738_v2 }
 0x844   : > { %v742_v3 = vsel %vm740_vm15, %v3945_v27, 32.0 }
 0x845   : > { %v746_v4 = vsel %vm588_vm2, %v742_v3, inf }
 0x846   : > { %747 = vmin.xlane.f32.xlu1 %v746_v4 }
 0x878   : > { %v3204_v5 = vpop.f32.mrf.mxu1 }
 0x87a   : > { %v1388_v6 = vpop.f32.mrf.mxu1 }
 0x87b   : > { %3264 = vmatprep.mubr.msk.f32.mxu0 %vm398_vm1, %v1388_v6 }
 0x87c   : > { %3265 = vmatmul.mubr.msk.f32.gmra.mxu0 %vm398_vm1, %v3204_v5 }
 0x8cb   : > { %v745_v7 = vpop.xlane.xlu0 %744 }
 0x8cc   : > { %vm749_vm0 = vcmp.eq.f32.partialorder %v3945_v27, %v745_v7 }
 0x8cd   : > { %v2819_v8 = vsel %vm749_vm0, 1.0, %v3750_v0  ;;  %v755_v9 = vsel %vm749_vm0, 1e+30, %v731_v56 }
 0x8ce   : > { %3205 = vmatprep.mubr.msk.f32.mxu1 %vm588_vm2, %v2819_v8  ;;  %v757_v10 = vsel %vm588_vm2, %v755_v9, inf }
 0x8cf   : > { %v748_v11 = vpop.xlane.xlu1 %747  ;;  %758 = vmin.xlane.f32.xlu0 %v757_v10 }
 0x8d0   : > { %vm750_vm3 = vcmp.eq.f32.partialorder %v3945_v27, %v748_v11 }
 0x8d1   : > { %v2820_v12 = vsel %vm750_vm3, 1.0, %v3750_v0  ;;  %v756_v13 = vsel %vm750_vm3, 1e+30, %v732_v60 }
 0x8d2   : > { %3206 = vmatmul.mubr.msk.f32.gmra.mxu1 %vm588_vm2, %v2820_v12  ;;  %v760_v14 = vsel %vm588_vm2, %v756_v13, inf }
 0x8d3   : > { %761 = vmin.xlane.f32.xlu1 %v760_v14 }
 0x958   : > { %v759_v15 = vpop.xlane.xlu0 %758 }
 0x959   : > { %vm763_vm4 = vcmp.eq.f32.partialorder %v755_v9, %v759_v15 }
 0x95a   : > { %v765_v16 = vsel %vm763_vm4, %v3945_v27, 32.0 }
 0x95b   : > { %v767_v17 = vsel %vm588_vm2, %v765_v16, inf }
 0x95c   : > { %v762_v18 = vpop.xlane.xlu1 %761  ;;  %768 = vmin.xlane.f32.xlu0 %v767_v17 }
 0x95d   : > { %vm764_vm5 = vcmp.eq.f32.partialorder %v756_v13, %v762_v18 }
 0x95e   : > { %v766_v19 = vsel %vm764_vm5, %v3945_v27, 32.0 }
 0x95f   : > { %v770_v20 = vsel %vm588_vm2, %v766_v19, inf }
 0x960   : > { %771 = vmin.xlane.f32.xlu1 %v770_v20 }
 0x992   : > { %v3207_v21 = vpop.f32.mrf.mxu1 }
 0x994   : > { %v1398_v22 = vpop.f32.mrf.mxu1 }
 0x995   : > { %3267 = vmatprep.mubr.msk.f32.mxu0 %vm398_vm1, %v1398_v22 }
 0x996   : > { %3268 = vmatmul.mubr.msk.f32.gmra.mxu0 %vm398_vm1, %v3207_v21 }
 0x9e5   : > { %v769_v23 = vpop.xlane.xlu0 %768 }
 0x9e6   : > { %vm773_vm6 = vcmp.eq.f32.partialorder %v3945_v27, %v769_v23 }
 0x9e7   : > { %v2821_v24 = vsel %vm773_vm6, 1.0, %v3750_v0  ;;  %v779_v25 = vsel %vm773_vm6, 1e+30, %v755_v9 }
 0x9e8   : > { %3208 = vmatprep.mubr.msk.f32.mxu1 %vm588_vm2, %v2821_v24  ;;  %v781_v26 = vsel %vm588_vm2, %v779_v25, inf }
 0x9e9   : > { %v772_v28 = vpop.xlane.xlu1 %771  ;;  %782 = vmin.xlane.f32.xlu0 %v781_v26 }
 0x9ea   : > { %vm774_vm7 = vcmp.eq.f32.partialorder %v3945_v27, %v772_v28 }
 0x9eb   : > { %v2822_v29 = vsel %vm774_vm7, 1.0, %v3750_v0  ;;  %v780_v30 = vsel %vm774_vm7, 1e+30, %v756_v13 }
 0x9ec   : > { %3209 = vmatmul.mubr.msk.f32.gmra.mxu1 %vm588_vm2, %v2822_v29  ;;  %v784_v31 = vsel %vm588_vm2, %v780_v30, inf }
 0x9ed   : > { %785 = vmin.xlane.f32.xlu1 %v784_v31 }
 0xa72   : > { %v783_v32 = vpop.xlane.xlu0 %782 }
 0xa73   : > { %vm787_vm8 = vcmp.eq.f32.partialorder %v779_v25, %v783_v32 }
 0xa74   : > { %v789_v33 = vsel %vm787_vm8, %v3945_v27, 32.0 }
 0xa75   : > { %v791_v34 = vsel %vm588_vm2, %v789_v33, inf }
 0xa76   : > { %v786_v35 = vpop.xlane.xlu1 %785  ;;  %792 = vmin.xlane.f32.xlu0 %v791_v34 }
 0xa77   : > { %vm788_vm9 = vcmp.eq.f32.partialorder %v780_v30, %v786_v35 }
 0xa78   : > { %v790_v36 = vsel %vm788_vm9, %v3945_v27, 32.0 }
 0xa79   : > { %v794_v37 = vsel %vm588_vm2, %v790_v36, inf }
 0xa7a   : > { %795 = vmin.xlane.f32.xlu1 %v794_v37 }
 0xaac   : > { %v3210_v38 = vpop.f32.mrf.mxu1 }
 0xaae   : > { %v1408_v39 = vpop.f32.mrf.mxu1 }
 0xaaf   : > { %3270 = vmatprep.mubr.msk.f32.mxu0 %vm398_vm1, %v1408_v39 }
 0xab0   : > { %3271 = vmatmul.mubr.msk.f32.gmra.mxu0 %vm398_vm1, %v3210_v38 }
 0xaff   : > { %v793_v40 = vpop.xlane.xlu0 %792 }
 0xb00   : > { %vm797_vm10 = vcmp.eq.f32.partialorder %v3945_v27, %v793_v40 }
 0xb01   : > { %v2823_v41 = vsel %vm797_vm10, 1.0, %v3750_v0  ;;  %v803_v42 = vsel %vm797_vm10, 1e+30, %v779_v25 }
 0xb02   : > { %3211 = vmatprep.mubr.msk.f32.mxu1 %vm588_vm2, %v2823_v41  ;;  %v805_v43 = vsel %vm588_vm2, %v803_v42, inf }
 0xb03   : > { %v796_v44 = vpop.xlane.xlu1 %795  ;;  %806 = vmin.xlane.f32.xlu0 %v805_v43 }
 0xb04   : > { %vm798_vm11 = vcmp.eq.f32.partialorder %v3945_v27, %v796_v44 }
 0xb05   : > { %v2824_v45 = vsel %vm798_vm11, 1.0, %v3750_v0  ;;  %v804_v46 = vsel %vm798_vm11, 1e+30, %v780_v30 }
 0xb06   : > { %3212 = vmatmul.mubr.msk.f32.gmra.mxu1 %vm588_vm2, %v2824_v45  ;;  %v808_v47 = vsel %vm588_vm2, %v804_v46, inf }
 0xb07   : > { %809 = vmin.xlane.f32.xlu1 %v808_v47 }
 0xb8c   : > { %v807_v48 = vpop.xlane.xlu0 %806 }
 0xb8d   : > { %vm811_vm12 = vcmp.eq.f32.partialorder %v803_v42, %v807_v48 }
 0xb8e   : > { %v813_v49 = vsel %vm811_vm12, %v3945_v27, 32.0 }
 0xb8f   : > { %v815_v50 = vsel %vm588_vm2, %v813_v49, inf }
 0xb90   : > { %v810_v51 = vpop.xlane.xlu1 %809  ;;  %816 = vmin.xlane.f32.xlu0 %v815_v50 }
 0xb91   : > { %vm812_vm13 = vcmp.eq.f32.partialorder %v804_v46, %v810_v51 }
 0xb92   : > { %v814_v52 = vsel %vm812_vm13, %v3945_v27, 32.0 }
 0xb93   : > { %v818_v53 = vsel %vm588_vm2, %v814_v52, inf }
 0xb94   : > { %819 = vmin.xlane.f32.xlu1 %v818_v53 }
 0xbc6   : > { %v3213_v54 = vpop.f32.mrf.mxu1 }
 0xbc8   : > { %v1418_v55 = vpop.f32.mrf.mxu1 }
 0xbc9   : > { %3273 = vmatprep.mubr.msk.f32.mxu0 %vm398_vm1, %v1418_v55 }
 0xbca   : > { %3274 = vmatmul.mubr.msk.f32.gmra.mxu0 %vm398_vm1, %v3213_v54 }
 0xc19   : > { %v817_v56 = vpop.xlane.xlu0 %816 }
 0xc1a   : > { %vm821_vm14 = vcmp.eq.f32.partialorder %v3945_v27, %v817_v56 }
 0xc1b   : > { %v2825_v57 = vsel %vm821_vm14, 1.0, %v3750_v0  ;;  %v827_v58 = vsel %vm821_vm14, 1e+30, %v803_v42 }
 0xc1c   : > { %3214 = vmatprep.mubr.msk.f32.mxu1 %vm588_vm2, %v2825_v57  ;;  %v829_v59 = vsel %vm588_vm2, %v827_v58, inf }
 0xc1d   : > { %v820_v60 = vpop.xlane.xlu1 %819  ;;  %830 = vmin.xlane.f32.xlu0 %v829_v59 }
 0xc1e   : > { %vm822_vm15 = vcmp.eq.f32.partialorder %v3945_v27, %v820_v60 }
 0xc1f   : > { %v2826_v61 = vsel %vm822_vm15, 1.0, %v3750_v0  ;;  %v828_v62 = vsel %vm822_vm15, 1e+30, %v804_v46 }
 0xc20   : > { %3215 = vmatmul.mubr.msk.f32.gmra.mxu1 %vm588_vm2, %v2826_v61  ;;  %v832_v63 = vsel %vm588_vm2, %v828_v62, inf }
 0xc21   : > { %833 = vmin.xlane.f32.xlu1 %v832_v63 }
 0xca6   : > { %v831_v1 = vpop.xlane.xlu0 %830 }
 0xca7   : > { %vm835_vm0 = vcmp.eq.f32.partialorder %v827_v58, %v831_v1 }
 0xca8   : > { %v837_v2 = vsel %vm835_vm0, %v3945_v27, 32.0 }
 0xca9   : > { %v839_v3 = vsel %vm588_vm2, %v837_v2, inf }
 0xcaa   : > { %v834_v4 = vpop.xlane.xlu1 %833  ;;  %840 = vmin.xlane.f32.xlu0 %v839_v3 }
 0xcab   : > { %vm836_vm3 = vcmp.eq.f32.partialorder %v828_v62, %v834_v4 }
 0xcac   : > { %v838_v5 = vsel %vm836_vm3, %v3945_v27, 32.0 }
 0xcad   : > { %v842_v6 = vsel %vm588_vm2, %v838_v5, inf }
 0xcae   : > { %843 = vmin.xlane.f32.xlu1 %v842_v6 }
 0xce0   : > { %v3216_v7 = vpop.f32.mrf.mxu1 }
 0xce2   : > { %v1428_v8 = vpop.f32.mrf.mxu1 }
 0xce3   : > { %3276 = vmatprep.mubr.msk.f32.mxu0 %vm398_vm1, %v1428_v8 }
 0xce4   : > { %3277 = vmatmul.mubr.msk.f32.gmra.mxu0 %vm398_vm1, %v3216_v7 }
 0xd33   : > { %v841_v9 = vpop.xlane.xlu0 %840 }
 0xd34   : > { %vm845_vm4 = vcmp.eq.f32.partialorder %v3945_v27, %v841_v9 }
 0xd35   : > { %v2827_v10 = vsel %vm845_vm4, 1.0, %v3750_v0  ;;  %v851_v11 = vsel %vm845_vm4, 1e+30, %v827_v58 }
 0xd36   : > { %3217 = vmatprep.mubr.msk.f32.mxu1 %vm588_vm2, %v2827_v10  ;;  %v853_v12 = vsel %vm588_vm2, %v851_v11, inf }
 0xd37   : > { %v844_v13 = vpop.xlane.xlu1 %843  ;;  %854 = vmin.xlane.f32.xlu0 %v853_v12 }
 0xd38   : > { %vm846_vm5 = vcmp.eq.f32.partialorder %v3945_v27, %v844_v13 }
 0xd39   : > { %v2828_v14 = vsel %vm846_vm5, 1.0, %v3750_v0  ;;  %v852_v15 = vsel %vm846_vm5, 1e+30, %v828_v62 }
 0xd3a   : > { %3218 = vmatmul.mubr.msk.f32.gmra.mxu1 %vm588_vm2, %v2828_v14  ;;  %v856_v16 = vsel %vm588_vm2, %v852_v15, inf }
 0xd3b   : > { %857 = vmin.xlane.f32.xlu1 %v856_v16 }
 0xdc0   : > { %v855_v17 = vpop.xlane.xlu0 %854 }
 0xdc1   : > { %vm859_vm6 = vcmp.eq.f32.partialorder %v851_v11, %v855_v17 }
 0xdc2   : > { %v861_v18 = vsel %vm859_vm6, %v3945_v27, 32.0 }
 0xdc3   : > { %v863_v19 = vsel %vm588_vm2, %v861_v18, inf }
 0xdc4   : > { %v858_v20 = vpop.xlane.xlu1 %857  ;;  %864 = vmin.xlane.f32.xlu0 %v863_v19 }
 0xdc5   : > { %vm860_vm7 = vcmp.eq.f32.partialorder %v852_v15, %v858_v20 }
 0xdc6   : > { %v862_v21 = vsel %vm860_vm7, %v3945_v27, 32.0 }
 0xdc7   : > { %v866_v22 = vsel %vm588_vm2, %v862_v21, inf }
 0xdc8   : > { %867 = vmin.xlane.f32.xlu1 %v866_v22 }
 0xdfa   : > { %v3219_v23 = vpop.f32.mrf.mxu1 }
 0xdfc   : > { %v1438_v24 = vpop.f32.mrf.mxu1 }
 0xdfd   : > { %3279 = vmatprep.mubr.msk.f32.mxu0 %vm398_vm1, %v1438_v24 }
 0xdfe   : > { %3280 = vmatmul.mubr.msk.f32.gmra.mxu0 %vm398_vm1, %v3219_v23 }
 0xe4d   : > { %v865_v25 = vpop.xlane.xlu0 %864 }
 0xe4e   : > { %vm869_vm8 = vcmp.eq.f32.partialorder %v3945_v27, %v865_v25 }
 0xe4f   : > { %v2829_v26 = vsel %vm869_vm8, 1.0, %v3750_v0  ;;  %v875_v28 = vsel %vm869_vm8, 1e+30, %v851_v11 }
 0xe50   : > { %3220 = vmatprep.mubr.msk.f32.mxu1 %vm588_vm2, %v2829_v26  ;;  %v877_v29 = vsel %vm588_vm2, %v875_v28, inf }
 0xe51   : > { %v868_v30 = vpop.xlane.xlu1 %867  ;;  %878 = vmin.xlane.f32.xlu0 %v877_v29 }
 0xe52   : > { %vm870_vm9 = vcmp.eq.f32.partialorder %v3945_v27, %v868_v30 }
 0xe53   : > { %v2830_v31 = vsel %vm870_vm9, 1.0, %v3750_v0  ;;  %v876_v32 = vsel %vm870_vm9, 1e+30, %v852_v15 }
 0xe54   : > { %3221 = vmatmul.mubr.msk.f32.gmra.mxu1 %vm588_vm2, %v2830_v31  ;;  %v880_v33 = vsel %vm588_vm2, %v876_v32, inf }
 0xe55   : > { %881 = vmin.xlane.f32.xlu1 %v880_v33 }
 0xeda   : > { %v879_v34 = vpop.xlane.xlu0 %878 }
 0xedb   : > { %vm883_vm10 = vcmp.eq.f32.partialorder %v875_v28, %v879_v34 }
 0xedc   : > { %v885_v35 = vsel %vm883_vm10, %v3945_v27, 32.0 }
 0xedd   : > { %v887_v36 = vsel %vm588_vm2, %v885_v35, inf }
 0xede   : > { %v882_v37 = vpop.xlane.xlu1 %881  ;;  %888 = vmin.xlane.f32.xlu0 %v887_v36 }
 0xedf   : > { %vm884_vm11 = vcmp.eq.f32.partialorder %v876_v32, %v882_v37 }
 0xee0   : > { %v886_v38 = vsel %vm884_vm11, %v3945_v27, 32.0 }
 0xee1   : > { %v890_v39 = vsel %vm588_vm2, %v886_v38, inf }
 0xee2   : > { %891 = vmin.xlane.f32.xlu1 %v890_v39 }
 0xf14   : > { %v3222_v40 = vpop.f32.mrf.mxu1 }
 0xf16   : > { %v1448_v41 = vpop.f32.mrf.mxu1 }
 0xf17   : > { %3282 = vmatprep.mubr.msk.f32.mxu0 %vm398_vm1, %v1448_v41 }
 0xf18   : > { %3283 = vmatmul.mubr.msk.f32.gmra.mxu0 %vm398_vm1, %v3222_v40 }
 0xf67   : > { %v889_v42 = vpop.xlane.xlu0 %888 }
 0xf68   : > { %vm893_vm12 = vcmp.eq.f32.partialorder %v3945_v27, %v889_v42 }
 0xf69   : > { %v2831_v43 = vsel %vm893_vm12, 1.0, %v3750_v0  ;;  %v899_v44 = vsel %vm893_vm12, 1e+30, %v875_v28 }
 0xf6a   : > { %3223 = vmatprep.mubr.msk.f32.mxu1 %vm588_vm2, %v2831_v43  ;;  %v901_v45 = vsel %vm588_vm2, %v899_v44, inf }
 0xf6b   : > { %v892_v46 = vpop.xlane.xlu1 %891  ;;  %902 = vmin.xlane.f32.xlu0 %v901_v45 }
 0xf6c   : > { %vm894_vm13 = vcmp.eq.f32.partialorder %v3945_v27, %v892_v46 }
 0xf6d   : > { %v2832_v47 = vsel %vm894_vm13, 1.0, %v3750_v0  ;;  %v900_v48 = vsel %vm894_vm13, 1e+30, %v876_v32 }
 0xf6e   : > { %3224 = vmatmul.mubr.msk.f32.gmra.mxu1 %vm588_vm2, %v2832_v47  ;;  %v904_v49 = vsel %vm588_vm2, %v900_v48, inf }
 0xf6f   : > { %905 = vmin.xlane.f32.xlu1 %v904_v49 }
 0xff4   : > { %v903_v50 = vpop.xlane.xlu0 %902 }
 0xff5   : > { %vm907_vm14 = vcmp.eq.f32.partialorder %v899_v44, %v903_v50 }
 0xff6   : > { %v909_v51 = vsel %vm907_vm14, %v3945_v27, 32.0 }
 0xff7   : > { %v911_v52 = vsel %vm588_vm2, %v909_v51, inf }
 0xff8   : > { %v906_v53 = vpop.xlane.xlu1 %905  ;;  %912 = vmin.xlane.f32.xlu0 %v911_v52 }
 0xff9   : > { %vm908_vm15 = vcmp.eq.f32.partialorder %v900_v48, %v906_v53 }
 0xffa   : > { %v910_v54 = vsel %vm908_vm15, %v3945_v27, 32.0 }
 0xffb   : > { %v914_v55 = vsel %vm588_vm2, %v910_v54, inf }
 0xffc   : > { %915 = vmin.xlane.f32.xlu1 %v914_v55 }
0x102e   : > { %v3225_v56 = vpop.f32.mrf.mxu1 }
0x1030   : > { %v1458_v57 = vpop.f32.mrf.mxu1 }
0x1031   : > { %3285 = vmatprep.mubr.msk.f32.mxu0 %vm398_vm1, %v1458_v57 }
0x1032   : > { %3286 = vmatmul.mubr.msk.f32.gmra.mxu0 %vm398_vm1, %v3225_v56 }
0x1081   : > { %v913_v58 = vpop.xlane.xlu0 %912 }
0x1082   : > { %vm917_vm0 = vcmp.eq.f32.partialorder %v3945_v27, %v913_v58 }
0x1083   : > { %v2833_v59 = vsel %vm917_vm0, 1.0, %v3750_v0  ;;  %v923_v60 = vsel %vm917_vm0, 1e+30, %v899_v44 }
0x1084   : > { %3226 = vmatprep.mubr.msk.f32.mxu1 %vm588_vm2, %v2833_v59  ;;  %v925_v61 = vsel %vm588_vm2, %v923_v60, inf }
0x1085   : > { %v916_v62 = vpop.xlane.xlu1 %915  ;;  %926 = vmin.xlane.f32.xlu0 %v925_v61 }
0x1086   : > { %vm918_vm3 = vcmp.eq.f32.partialorder %v3945_v27, %v916_v62 }
0x1087   : > { %v2834_v63 = vsel %vm918_vm3, 1.0, %v3750_v0  ;;  %v924_v1 = vsel %vm918_vm3, 1e+30, %v900_v48 }
0x1088   : > { %3227 = vmatmul.mubr.msk.f32.gmra.mxu1 %vm588_vm2, %v2834_v63  ;;  %v928_v2 = vsel %vm588_vm2, %v924_v1, inf }
0x1089   : > { %929 = vmin.xlane.f32.xlu1 %v928_v2 }
0x110e   : > { %v927_v3 = vpop.xlane.xlu0 %926 }
0x110f   : > { %vm931_vm4 = vcmp.eq.f32.partialorder %v923_v60, %v927_v3 }
0x1110   : > { %v933_v4 = vsel %vm931_vm4, %v3945_v27, 32.0 }
0x1111   : > { %v935_v5 = vsel %vm588_vm2, %v933_v4, inf }
0x1112   : > { %v930_v6 = vpop.xlane.xlu1 %929  ;;  %936 = vmin.xlane.f32.xlu0 %v935_v5 }
0x1113   : > { %vm932_vm5 = vcmp.eq.f32.partialorder %v924_v1, %v930_v6 }
0x1114   : > { %v934_v7 = vsel %vm932_vm5, %v3945_v27, 32.0 }
0x1115   : > { %v938_v8 = vsel %vm588_vm2, %v934_v7, inf }
0x1116   : > { %939 = vmin.xlane.f32.xlu1 %v938_v8 }
0x1148   : > { %v3228_v9 = vpop.f32.mrf.mxu1 }
0x114a   : > { %v1468_v10 = vpop.f32.mrf.mxu1 }
0x114b   : > { %3288 = vmatprep.mubr.msk.f32.mxu0 %vm398_vm1, %v1468_v10 }
0x114c   : > { %3289 = vmatmul.mubr.msk.f32.gmra.mxu0 %vm398_vm1, %v3228_v9 }
0x119b   : > { %v937_v11 = vpop.xlane.xlu0 %936 }
0x119c   : > { %vm941_vm6 = vcmp.eq.f32.partialorder %v3945_v27, %v937_v11 }
0x119d   : > { %v2835_v12 = vsel %vm941_vm6, 1.0, %v3750_v0  ;;  %v947_v13 = vsel %vm941_vm6, 1e+30, %v923_v60 }
0x119e   : > { %3229 = vmatprep.mubr.msk.f32.mxu1 %vm588_vm2, %v2835_v12  ;;  %v949_v14 = vsel %vm588_vm2, %v947_v13, inf }
0x119f   : > { %v940_v15 = vpop.xlane.xlu1 %939  ;;  %950 = vmin.xlane.f32.xlu0 %v949_v14 }
0x11a0   : > { %vm942_vm7 = vcmp.eq.f32.partialorder %v3945_v27, %v940_v15 }
0x11a1   : > { %v2836_v16 = vsel %vm942_vm7, 1.0, %v3750_v0  ;;  %v948_v17 = vsel %vm942_vm7, 1e+30, %v924_v1 }
0x11a2   : > { %3230 = vmatmul.mubr.msk.f32.gmra.mxu1 %vm588_vm2, %v2836_v16  ;;  %v952_v18 = vsel %vm588_vm2, %v948_v17, inf }
0x11a3   : > { %953 = vmin.xlane.f32.xlu1 %v952_v18 }
0x1228   : > { %v951_v19 = vpop.xlane.xlu0 %950 }
0x1229   : > { %vm955_vm8 = vcmp.eq.f32.partialorder %v947_v13, %v951_v19 }
0x122a   : > { %v957_v20 = vsel %vm955_vm8, %v3945_v27, 32.0 }
0x122b   : > { %v959_v21 = vsel %vm588_vm2, %v957_v20, inf }
0x122c   : > { %v954_v22 = vpop.xlane.xlu1 %953  ;;  %960 = vmin.xlane.f32.xlu0 %v959_v21 }
0x122d   : > { %vm956_vm9 = vcmp.eq.f32.partialorder %v948_v17, %v954_v22 }
0x122e   : > { %v958_v23 = vsel %vm956_vm9, %v3945_v27, 32.0 }
0x122f   : > { %v962_v24 = vsel %vm588_vm2, %v958_v23, inf }
0x1230   : > { %963 = vmin.xlane.f32.xlu1 %v962_v24 }
0x1262   : > { %v3231_v25 = vpop.f32.mrf.mxu1 }
0x1264   : > { %v1478_v26 = vpop.f32.mrf.mxu1 }
0x1265   : > { %3291 = vmatprep.mubr.msk.f32.mxu0 %vm398_vm1, %v1478_v26 }
0x1266   : > { %3292 = vmatmul.mubr.msk.f32.gmra.mxu0 %vm398_vm1, %v3231_v25 }
0x12b5   : > { %v961_v28 = vpop.xlane.xlu0 %960 }
0x12b6   : > { %vm965_vm10 = vcmp.eq.f32.partialorder %v3945_v27, %v961_v28 }
0x12b7   : > { %v2837_v29 = vsel %vm965_vm10, 1.0, %v3750_v0  ;;  %v971_v30 = vsel %vm965_vm10, 1e+30, %v947_v13 }
0x12b8   : > { %3232 = vmatprep.mubr.msk.f32.mxu1 %vm588_vm2, %v2837_v29  ;;  %v973_v31 = vsel %vm588_vm2, %v971_v30, inf }
0x12b9   : > { %v964_v32 = vpop.xlane.xlu1 %963  ;;  %974 = vmin.xlane.f32.xlu0 %v973_v31  ;;  %v374_v31 = vld [vmem:[#allocation2 + $0x70] sm:$0xff] }
0x12ba   : > { %vm966_vm11 = vcmp.eq.f32.partialorder %v3945_v27, %v964_v32  ;;  %v373_v32 = vld [vmem:[#allocation2 + $0x68] sm:$0xff] }
0x12bb   : > { %v2838_v33 = vsel %vm966_vm11, 1.0, %v3750_v0  ;;  %v972_v34 = vsel %vm966_vm11, 1e+30, %v948_v17 }
0x12bc   : > { %3233 = vmatmul.mubr.msk.f32.gmra.mxu1 %vm588_vm2, %v2838_v33  ;;  %v976_v35 = vsel %vm588_vm2, %v972_v34, inf  ;;  %v372_v33 = vld [vmem:[#allocation2 + $0x60] sm:$0xff] }
0x12bd   : > { %977 = vmin.xlane.f32.xlu1 %v976_v35  ;;  %v370_v35 = vld [vmem:[#allocation2 + $0x50] sm:$0xff] }
0x1342   : > { %v975_v36 = vpop.xlane.xlu0 %974 }
0x1343   : > { %vm979_vm12 = vcmp.eq.f32.partialorder %v971_v30, %v975_v36 }
0x1344   : > { %v981_v37 = vsel %vm979_vm12, %v3945_v27, 32.0 }
0x1345   : > { %v983_v38 = vsel %vm588_vm2, %v981_v37, inf  ;;  %v369_v37 = vld [vmem:[#allocation2 + $0x48] sm:$0xff] }
0x1346   : > { %v978_v39 = vpop.xlane.xlu1 %977  ;;  %984 = vmin.xlane.f32.xlu0 %v983_v38 }
0x1347   : > { %vm980_vm13 = vcmp.eq.f32.partialorder %v972_v34, %v978_v39  ;;  %v368_v39 = vld [vmem:[#allocation2 + $0x40] sm:$0xff] }
0x1348   : > { %v982_v40 = vsel %vm980_vm13, %v3945_v27, 32.0 }
0x1349   : > { %v986_v41 = vsel %vm588_vm2, %v982_v40, inf }
0x134a   : > { %987 = vmin.xlane.f32.xlu1 %v986_v41  ;;  %v367_v41 = vld [vmem:[#allocation2 + $0x38] sm:$0xff] }
0x137c   : > { %v3234_v42 = vpop.f32.mrf.mxu1 }
0x137e   : > { %v1488_v43 = vpop.f32.mrf.mxu1 }
0x137f   : > { %3294 = vmatprep.mubr.msk.f32.mxu0 %vm398_vm1, %v1488_v43  ;;  %v366_v43 = vld [vmem:[#allocation2 + $0x30] sm:$0xff] }
0x1380   : > { %3295 = vmatmul.mubr.msk.f32.gmra.mxu0 %vm398_vm1, %v3234_v42 }
0x13cf   : > { %v985_v44 = vpop.xlane.xlu0 %984 }
0x13d0   : > { %vm989_vm14 = vcmp.eq.f32.partialorder %v3945_v27, %v985_v44  ;;  %v365_v44 = vld [vmem:[#allocation2 + $0x28] sm:$0xff] }
0x13d1   : > { %v2839_v45 = vsel %vm989_vm14, 1.0, %v3750_v0  ;;  %v995_v46 = vsel %vm989_vm14, 1e+30, %v971_v30  ;;  %v375_v30 = vld [vmem:[#allocation2 + $0x78] sm:$0xff] }
0x13d2   : > { %3235 = vmatprep.mubr.msk.f32.mxu1 %vm588_vm2, %v2839_v45  ;;  %v997_v47 = vsel %vm588_vm2, %v995_v46, inf  ;;  %3309 = vmatprep.subr.mxu0 %v375_v30  ;;  %v364_v45 = vld [vmem:[#allocation2 + $0x20] sm:$0xff] }
0x13d3   : > { %v988_v48 = vpop.xlane.xlu1 %987  ;;  %998 = vmin.xlane.f32.xlu0 %v997_v47  ;;  %3310 = vmatpush3.msra.mxu0 %v375_v30  ;;  %v360_v47 = vld [vmem:[#allocation2] sm:$0xff] }
0x13d4   : > { %vm990_vm15 = vcmp.eq.f32.partialorder %v3945_v27, %v988_v48  ;;  %3311 = vmatprep.subr.mxu0 %v374_v31  ;;  %v3178_v48 = vpop.f32.mrf.mxu0 }
0x13d5   : > { %v2840_v49 = vsel %vm990_vm15, 1.0, %v3750_v0  ;;  %v996_v50 = vsel %vm990_vm15, 1e+30, %v972_v34  ;;  %3312 = vmatpush3.msra.mxu0 %v374_v31  ;;  %v371_v34 = vld [vmem:[#allocation2 + $0x58] sm:$0xff] }
0x13d6   : > { %3236 = vmatmul.mubr.msk.f32.gmra.mxu1 %vm588_vm2, %v2840_v49  ;;  %v1000_v51 = vsel %vm588_vm2, %v996_v50, inf  ;;  %3313 = vmatprep.subr.mxu0 %v373_v32  ;;  %v1143_v49 = vpop.f32.mrf.mxu0 }
0x13d7   : > { %1001 = vmin.xlane.f32.xlu1 %v1000_v51  ;;  %3314 = vmatpush3.msra.mxu0 %v373_v32  ;;  %v391_v51 = vld [vmem:[#allocation5 + $0x70] sm:$0xff] }
0x13d8   : > { %3315 = vmatprep.subr.mxu0 %v372_v33 }
0x13d9   : > { %3316 = vmatpush3.msra.mxu0 %v372_v33 }
0x13da   : > { %3317 = vmatprep.subr.mxu0 %v371_v34 }
0x13db   : > { %3318 = vmatpush3.msra.mxu0 %v371_v34 }
0x13dc   : > { %3319 = vmatprep.subr.mxu0 %v370_v35 }
0x13dd   : > { %3320 = vmatpush3.msra.mxu0 %v370_v35 }
0x13de   : > { %3321 = vmatprep.subr.mxu0 %v369_v37 }
0x13df   : > { %3322 = vmatpush3.msra.mxu0 %v369_v37 }
0x13e0   : > { %3323 = vmatprep.subr.mxu0 %v368_v39 }
0x13e1   : > { %3324 = vmatpush3.msra.mxu0 %v368_v39 }
0x13e2   : > { %3325 = vmatprep.subr.mxu0 %v367_v41 }
0x13e3   : > { %3326 = vmatpush3.msra.mxu0 %v367_v41 }
0x13e4   : > { %3327 = vmatprep.subr.mxu0 %v366_v43 }
0x13e5   : > { %3328 = vmatpush3.msra.mxu0 %v366_v43 }
0x13e6   : > { %3329 = vmatprep.subr.mxu0 %v365_v44 }
0x13e7   : > { %3330 = vmatpush3.msra.mxu0 %v365_v44 }
0x13e8   : > { %3331 = vmatprep.subr.mxu0 %v364_v45 }
0x13e9   : > { %3332 = vmatpush3.msra.mxu0 %v364_v45 }
0x145c   : > { %v999_v52 = vpop.xlane.xlu0 %998 }
0x145d   : > { %vm1003_vm0 = vcmp.eq.f32.partialorder %v995_v46, %v999_v52  ;;  %v390_v52 = vld [vmem:[#allocation5 + $0x68] sm:$0xff] }
0x145e   : > { %v1005_v53 = vsel %vm1003_vm0, %v3945_v27, 32.0 }
0x145f   : > { %v1007_v54 = vsel %vm588_vm2, %v1005_v53, inf  ;;  %v3251_v53 = vpop.f32.mrf.mxu0 }
0x1460   : > { %v1002_v55 = vpop.xlane.xlu1 %1001  ;;  %1008 = vmin.xlane.f32.xlu0 %v1007_v54  ;;  %v389_v54 = vld [vmem:[#allocation5 + $0x60] sm:$0xff] }
0x1461   : > { %vm1004_vm3 = vcmp.eq.f32.partialorder %v996_v50, %v1002_v55  ;;  %v388_v55 = vld [vmem:[#allocation5 + $0x58] sm:$0xff] }
0x1462   : > { %v1006_v56 = vsel %vm1004_vm3, %v3945_v27, 32.0 }
0x1463   : > { %v1010_v57 = vsel %vm588_vm2, %v1006_v56, inf  ;;  %v1726_v56 = vpop.f32.mrf.mxu0 }
0x1464   : > { %1011 = vmin.xlane.f32.xlu1 %v1010_v57  ;;  %v387_v57 = vld [vmem:[#allocation5 + $0x50] sm:$0xff] }
0x1496   : > { %v3237_v58 = vpop.f32.mrf.mxu1 }
0x1498   : > { %v1498_v59 = vpop.f32.mrf.mxu1 }
0x1499   : > { %3297 = vmatprep.mubr.msk.f32.mxu0 %vm398_vm1, %v1498_v59  ;;  %v386_v59 = vld [vmem:[#allocation5 + $0x48] sm:$0xff] }
0x149a   : > { %3298 = vmatmul.mubr.msk.f32.gmra.mxu0 %vm398_vm1, %v3237_v58  ;;  %v3254_v58 = vpop.f32.mrf.mxu0 }
0x14e9   : > { %v1009_v60 = vpop.xlane.xlu0 %1008 }
0x14ea   : > { %vm1013_vm4 = vcmp.eq.f32.partialorder %v3945_v27, %v1009_v60  ;;  %v385_v60 = vld [vmem:[#allocation5 + $0x40] sm:$0xff] }
0x14eb   : > { %v2841_v61 = vsel %vm1013_vm4, 1.0, %v3750_v0  ;;  %v1019_v62 = vsel %vm1013_vm4, 1e+30, %v995_v46  ;;  %v363_v46 = vld [vmem:[#allocation2 + $0x18] sm:$0xff] }
0x14ec   : > { %3238 = vmatprep.mubr.msk.f32.mxu1 %vm588_vm2, %v2841_v61  ;;  %v1021_v63 = vsel %vm588_vm2, %v1019_v62, inf  ;;  %3333 = vmatprep.subr.mxu0 %v363_v46  ;;  %v1736_v61 = vpop.f32.mrf.mxu0 }
0x14ed   : > { %v1012_v1 = vpop.xlane.xlu1 %1011  ;;  %1022 = vmin.xlane.f32.xlu0 %v1021_v63  ;;  %3334 = vmatpush3.msra.mxu0 %v363_v46 }
0x14ee   : > { %vm1014_vm5 = vcmp.eq.f32.partialorder %v3945_v27, %v1012_v1  ;;  %v3257_v63 = vpop.f32.mrf.mxu0  ;;  %v383_v1 = vld [vmem:[#allocation5 + $0x30] sm:$0xff] }
0x14ef   : > { %v2842_v2 = vsel %vm1014_vm5, 1.0, %v3750_v0  ;;  %v1020_v3 = vsel %vm1014_vm5, 1e+30, %v996_v50  ;;  %v392_v50 = vld [vmem:[#allocation5 + $0x78] sm:$0xff] }
0x14f0   : > { %3239 = vmatmul.mubr.msk.f32.gmra.mxu1 %vm588_vm2, %v2842_v2  ;;  %v1024_v4 = vsel %vm588_vm2, %v1020_v3, inf  ;;  %3401 = vmatprep.subr.mxu1 %v392_v50  ;;  %v1746_v2 = vpop.f32.mrf.mxu0 }
0x14f1   : > { %1025 = vmin.xlane.f32.xlu1 %v1024_v4  ;;  %3402 = vmatpush3.msra.mxu1 %v392_v50 }
0x14f2   : > { %3403 = vmatprep.subr.mxu1 %v391_v51 }
0x14f3   : > { %3404 = vmatpush3.msra.mxu1 %v391_v51 }
0x14f4   : > { %3405 = vmatprep.subr.mxu1 %v390_v52 }
0x14f5   : > { %3406 = vmatpush3.msra.mxu1 %v390_v52 }
0x14f6   : > { %3407 = vmatprep.subr.mxu1 %v389_v54 }
0x14f7   : > { %3408 = vmatpush3.msra.mxu1 %v389_v54 }
0x14f8   : > { %3409 = vmatprep.subr.mxu1 %v388_v55 }
0x14f9   : > { %3410 = vmatpush3.msra.mxu1 %v388_v55 }
0x14fa   : > { %3411 = vmatprep.subr.mxu1 %v387_v57 }
0x14fb   : > { %3412 = vmatpush3.msra.mxu1 %v387_v57 }
0x14fc   : > { %3413 = vmatprep.subr.mxu1 %v386_v59 }
0x14fd   : > { %3414 = vmatpush3.msra.mxu1 %v386_v59 }
0x14fe   : > { %3415 = vmatprep.subr.mxu1 %v385_v60 }
0x14ff   : > { %3416 = vmatpush3.msra.mxu1 %v385_v60 }
0x1576   : > { %v1023_v5 = vpop.xlane.xlu0 %1022 }
0x1577   : > { %vm1027_vm6 = vcmp.eq.f32.partialorder %v1019_v62, %v1023_v5 }
0x1578   : > { %v1029_v6 = vsel %vm1027_vm6, %v3945_v27, 32.0 }
0x1579   : > { %v1031_v7 = vsel %vm588_vm2, %v1029_v6, inf }
0x157a   : > { %v1026_v8 = vpop.xlane.xlu1 %1025  ;;  %1032 = vmin.xlane.f32.xlu0 %v1031_v7 }
0x157b   : > { %vm1028_vm7 = vcmp.eq.f32.partialorder %v1020_v3, %v1026_v8 }
0x157c   : > { %v1030_v9 = vsel %vm1028_vm7, %v3945_v27, 32.0 }
0x157d   : > { %v1034_v10 = vsel %vm588_vm2, %v1030_v9, inf }
0x157e   : > { %1035 = vmin.xlane.f32.xlu1 %v1034_v10  ;;  %v2847_v10 = vld [vmem:[%s4470_s3] ss:$0 sm:$0xff] }
0x15b0   : > { %v3240_v11 = vpop.f32.mrf.mxu1 }
0x15b2   : > { %v1508_v12 = vpop.f32.mrf.mxu1 }
0x15b3   : > { %3300 = vmatprep.mubr.msk.f32.mxu0 %vm398_vm1, %v1508_v12 }
0x15b4   : > { %3301 = vmatmul.mubr.msk.f32.gmra.mxu0 %vm398_vm1, %v3240_v11  ;;  %v4233_v11 = vadd.f32 %v2847_v10, %v1143_v49 }
0x1603   : > { %v1033_v13 = vpop.xlane.xlu0 %1032 }
0x1604   : > { %vm1037_vm8 = vcmp.eq.f32.partialorder %v3945_v27, %v1033_v13  ;;  %v4235_v13 = vadd.f32 %v3178_v48, %v2847_v10 }
0x1605   : > { %v2843_v14 = vsel %vm1037_vm8, 1.0, %v3750_v0  ;;  %v1043_v15 = vsel %vm1037_vm8, 1e+30, %v1019_v62  ;;  %v384_v62 = vld [vmem:[#allocation5 + $0x38] sm:$0xff] }
0x1606   : > { %3241 = vmatprep.mubr.msk.f32.mxu1 %vm588_vm2, %v2843_v14  ;;  %v1045_v16 = vsel %vm588_vm2, %v1043_v15, inf  ;;  %3417 = vmatprep.subr.mxu1 %v384_v62  ;;  %v1930_v30 = vadd.f32 %v3257_v63, %v4235_v13 }
0x1607   : > { %v1036_v17 = vpop.xlane.xlu1 %1035  ;;  %1046 = vmin.xlane.f32.xlu0 %v1045_v16  ;;  %3418 = vmatpush3.msra.mxu1 %v384_v62 }
0x1608   : > { %vm1038_vm9 = vcmp.eq.f32.partialorder %v3945_v27, %v1036_v17  ;;  %3419 = vmatprep.subr.mxu1 %v383_v1  ;;  %v1926_v17 = vadd.f32 %v3251_v53, %v4235_v13  ;;  %v1970_v34 = vmax.f32 %v1930_v30, 0.0 }
0x1609   : > { %v2844_v18 = vsel %vm1038_vm9, 1.0, %v3750_v0  ;;  %v1044_v19 = vsel %vm1038_vm9, 1e+30, %v1020_v3  ;;  %3420 = vmatpush3.msra.mxu1 %v383_v1  ;;  %v3260_v3 = vpop.f32.mrf.mxu0 }
0x160a   : > { %3242 = vmatmul.mubr.msk.f32.gmra.mxu1 %vm588_vm2, %v2844_v18  ;;  %v1048_v20 = vsel %vm588_vm2, %v1044_v19, inf  ;;  %v1932_v35 = vadd.f32 %v3260_v3, %v4235_v13 }
0x160b   : > { %1049 = vmin.xlane.f32.xlu1 %v1048_v20  ;;  %v1756_v4 = vpop.f32.mrf.mxu0 }
0x160c   : > { %v1931_v33 = vadd.f32 %v1756_v4, %v4233_v11 }
0x160d   : > { %v3263_v5 = vpop.f32.mrf.mxu0 }
0x160e   : > { %v1971_v37 = vmax.f32 %v1931_v33, 0.0  ;;  %v1934_v41 = vadd.f32 %v3263_v5, %v4235_v13 }
0x160f   : > { %v1766_v6 = vpop.f32.mrf.mxu0 }
0x1610   : > { %v1974_v45 = vmax.f32 %v1934_v41, 0.0 }
0x1611   : > { %v3266_v7 = vpop.f32.mrf.mxu0 }
0x1612   : > { %v1936_v46 = vadd.f32 %v3266_v7, %v4235_v13 }
0x1613   : > { %v1776_v8 = vpop.f32.mrf.mxu0 }
0x1614   : > { %v1935_v43 = vadd.f32 %v1776_v8, %v4233_v11  ;;  %v1976_v48 = vmax.f32 %v1936_v46, 0.0  ;;  %v382_v46 = vld [vmem:[#allocation5 + $0x28] sm:$0xff] }
0x1615   : > { %v3269_v9 = vpop.f32.mrf.mxu0  ;;  %3421 = vmatprep.subr.mxu1 %v382_v46 }
0x1616   : > { %v1938_v49 = vadd.f32 %v3269_v9, %v4235_v13  ;;  %3422 = vmatpush3.msra.mxu1 %v382_v46 }
0x1617   : > { %v1786_v12 = vpop.f32.mrf.mxu0 }
0x1618   : > { %v1978_v54 = vmax.f32 %v1938_v49, 0.0 }
0x1619   : > { %v3272_v14 = vpop.f32.mrf.mxu0 }
0x161a   : > { %v1940_v55 = vadd.f32 %v3272_v14, %v4235_v13 }
0x161b   : > { %v1796_v18 = vpop.f32.mrf.mxu0 }
0x161c   : > { %v1939_v52 = vadd.f32 %v1796_v18, %v4233_v11  ;;  %v1980_v59 = vmax.f32 %v1940_v55, 0.0 }
0x1690   : > { %v1047_v21 = vpop.xlane.xlu0 %1046 }
0x1691   : > { %vm1051_vm10 = vcmp.eq.f32.partialorder %v1043_v15, %v1047_v21  ;;  %v1925_v15 = vadd.f32 %v1726_v56, %v4233_v11  ;;  %v1927_v21 = vadd.f32 %v1736_v61, %v4233_v11  ;;  %v1979_v56 = vmax.f32 %v1939_v52, 0.0  ;;  %v379_v52 = vld [vmem:[#allocation5 + $0x10] sm:$0xff] }
0x1692   : > { %v1053_v22 = vsel %vm1051_vm10, %v3945_v27, 32.0 }
0x1693   : > { %v1055_v23 = vsel %vm588_vm2, %v1053_v22, inf  ;;  %v1965_v20 = vmax.f32 %v1925_v15, 0.0  ;;  %v3275_v22 = vpop.f32.mrf.mxu0 }
0x1694   : > { %v1050_v24 = vpop.xlane.xlu1 %1049  ;;  %1056 = vmin.xlane.f32.xlu0 %v1055_v23  ;;  %v1966_v23 = vmax.f32 %v1926_v17, 0.0  ;;  %v1942_v60 = vadd.f32 %v3275_v22, %v4235_v13 }
0x1695   : > { %vm1052_vm11 = vcmp.eq.f32.partialorder %v1044_v19, %v1050_v24  ;;  %v1928_v24 = vadd.f32 %v3254_v58, %v4235_v13 }
0x1696   : > { %v1054_v25 = vsel %vm1052_vm11, %v3945_v27, 32.0  ;;  %v1982_v1 = vmax.f32 %v1942_v60, 0.0 }
0x1697   : > { %v1058_v26 = vsel %vm588_vm2, %v1054_v25, inf  ;;  %v1967_v25 = vmax.f32 %v1927_v21, 0.0 }
0x1698   : > { %1059 = vmin.xlane.f32.xlu1 %v1058_v26  ;;  %v1929_v26 = vadd.f32 %v1746_v2, %v4233_v11 }
0x169a   : > { %v1969_v32 = vmax.f32 %v1929_v26, 0.0 }
0x16ca   : > { %v3243_v28 = vpop.f32.mrf.mxu1 }
0x16cc   : > { %v1518_v29 = vpop.f32.mrf.mxu1 }
0x16cd   : > { %3303 = vmatprep.mubr.msk.f32.mxu0 %vm398_vm1, %v1518_v29  ;;  %v1968_v29 = vmax.f32 %v1928_v24, 0.0 }
0x16ce   : > { %3304 = vmatmul.mubr.msk.f32.gmra.mxu0 %vm398_vm1, %v3243_v28  ;;  %v1806_v28 = vpop.f32.mrf.mxu0 }
0x16cf   : > { %v1941_v57 = vadd.f32 %v1806_v28, %v4233_v11 }
0x16d0   : > { %v3278_v31 = vpop.f32.mrf.mxu0 }
0x16d1   : > { %v1981_v62 = vmax.f32 %v1941_v57, 0.0  ;;  %v1944_v2 = vadd.f32 %v3278_v31, %v4235_v13  ;;  %v377_v57 = vld [vmem:[#allocation5] sm:$0xff] }
0x16d3   : > { %v1984_v7 = vmax.f32 %v1944_v2, 0.0 }
0x171d   : > { %v1057_v36 = vpop.xlane.xlu0 %1056 }
0x171e   : > { %vm1061_vm12 = vcmp.eq.f32.partialorder %v3945_v27, %v1057_v36  ;;  %v1816_v36 = vpop.f32.mrf.mxu0 }
0x171f   : > { %v2845_v38 = vsel %vm1061_vm12, 1.0, %v3750_v0  ;;  %v1943_v63 = vadd.f32 %v1816_v36, %v4233_v11 }
0x1720   : > { %3244 = vmatprep.mubr.msk.f32.mxu1 %vm588_vm2, %v2845_v38  ;;  %v1933_v38 = vadd.f32 %v1766_v6, %v4233_v11  ;;  %v3281_v39 = vpop.f32.mrf.mxu0 }
0x1721   : > { %v1060_v40 = vpop.xlane.xlu1 %1059  ;;  %v1983_v4 = vmax.f32 %v1943_v63, 0.0  ;;  %v1946_v8 = vadd.f32 %v3281_v39, %v4235_v13  ;;  %v4282_v63 = vld [vmem:[%s4472_s5] ss:$0 sm:$0xff] }
0x1722   : > { %vm1062_vm13 = vcmp.eq.f32.partialorder %v3945_v27, %v1060_v40  ;;  %v362_v27 = vld [vmem:[#allocation2 + $0x10] sm:$0xff]  ;;  %v1972_v40 = vmax.f32 %v1932_v35, 0.0  ;;  %v1826_v44 = vpop.f32.mrf.mxu0 }
0x1723   : > { %v2846_v42 = vsel %vm1062_vm13, 1.0, %v3750_v0  ;;  %3335 = vmatprep.subr.mxu0 %v362_v27  ;;  %v361_v0 = vld [vmem:[#allocation2 + $0x8] sm:$0xff]  ;;  %v1945_v5 = vadd.f32 %v1826_v44, %v4233_v11  ;;  %v1986_v14 = vmax.f32 %v1946_v8, 0.0 }
0x1724   : > { %3245 = vmatmul.mubr.msk.f32.gmra.mxu1 %vm588_vm2, %v2846_v42  ;;  %3336 = vmatpush3.msra.mxu0 %v362_v27  ;;  %v1973_v42 = vmax.f32 %v1933_v38, 0.0  ;;  %v3284_v27 = vpop.f32.mrf.mxu0 }
0x1725   : > { %3337 = vmatprep.subr.mxu0 %v361_v0  ;;  %v1985_v9 = vmax.f32 %v1945_v5, 0.0  ;;  %v1948_v15 = vadd.f32 %v3284_v27, %v4235_v13 }
0x1726   : > { %3338 = vmatpush3.msra.mxu0 %v361_v0  ;;  %v1975_v0 = vmax.f32 %v1935_v43, 0.0  ;;  %v1836_v50 = vpop.f32.mrf.mxu0 }
0x1727   : > { %3339 = vmatprep.subr.mxu0 %v360_v47  ;;  %v1947_v10 = vadd.f32 %v1836_v50, %v4233_v11 }
0x1728   : > { %3340 = vmatpush3.msra.mxu0 %v360_v47  ;;  %v1937_v47 = vadd.f32 %v1786_v12, %v4233_v11  ;;  %v3287_v53 = vpop.f32.mrf.mxu0 }
0x1729   : > { %v1987_v17 = vmax.f32 %v1947_v10, 0.0 }
0x172a   : > { %v1977_v51 = vmax.f32 %v1937_v47, 0.0  ;;  %v1846_v58 = vpop.f32.mrf.mxu0 }
0x172b   : > { %v1949_v18 = vadd.f32 %v1846_v58, %v4233_v11 }
0x172c   : > { %v3290_v61 = vpop.f32.mrf.mxu0 }
0x172d   : > { %v1989_v22 = vmax.f32 %v1949_v18, 0.0  ;;  %v1952_v26 = vadd.f32 %v3290_v61, %v4235_v13 }
0x172e   : > { %v1856_v3 = vpop.f32.mrf.mxu0 }
0x172f   : > { %v1992_v31 = vmax.f32 %v1952_v26, 0.0 }
0x1730   : > { %v3293_v6 = vpop.f32.mrf.mxu0 }
0x1732   : > { %v1866_v12 = vpop.f32.mrf.mxu0 }
0x17e4   : > { %v3246_v16 = vpop.f32.mrf.mxu1 }
0x17e6   : > { %v1528_v19 = vpop.f32.mrf.mxu1 }
0x17e7   : > { %3306 = vmatprep.mubr.msk.f32.mxu0 %vm398_vm1, %v1528_v19  ;;  %v1988_v19 = vmax.f32 %v1948_v15, 0.0 }
0x17e8   : > { %3307 = vmatmul.mubr.msk.f32.gmra.mxu0 %vm398_vm1, %v3246_v16  ;;  %v3296_v16 = vpop.f32.mrf.mxu0 }
0x17e9   : > { %3341 = vmatprep.mubr.f32.mxu0 %v1965_v20  ;;  %v1950_v20 = vadd.f32 %v3287_v53, %v4235_v13 }
0x17ea   : > { %v1876_v21 = vpop.f32.mrf.mxu0 }
0x17eb   : > { %v1955_v35 = vadd.f32 %v1876_v21, %v4233_v11 }
0x17ec   : > { %3342 = vmatmul.mubr.f32.vlgmr.msra.gmra.mxu0 %v1966_v23  ;;  %v1951_v23 = vadd.f32 %v1856_v3, %v4233_v11  ;;  %v3299_v24 = vpop.f32.mrf.mxu0 }
0x17ed   : > { %3344 = vmatprep.mubr.f32.mxu0 %v1967_v25  ;;  %v1990_v25 = vmax.f32 %v1950_v20, 0.0  ;;  %v1995_v39 = vmax.f32 %v1955_v35, 0.0  ;;  %v1958_v43 = vadd.f32 %v3299_v24, %v4235_v13 }
0x17ee   : > { %v1991_v28 = vmax.f32 %v1951_v23, 0.0  ;;  %v1886_v30 = vpop.f32.mrf.mxu0 }
0x17ef   : > { %v1998_v47 = vmax.f32 %v1958_v43, 0.0 }
0x17f0   : > { %3345 = vmatmul.mubr.f32.gmra.mxu0 %v1968_v29  ;;  %v1953_v29 = vadd.f32 %v1866_v12, %v4233_v11  ;;  %v3302_v33 = vpop.f32.mrf.mxu0 }
0x17f1   : > { %3347 = vmatprep.mubr.f32.mxu0 %v1969_v32  ;;  %v1954_v32 = vadd.f32 %v3293_v6, %v4235_v13 }
0x17f2   : > { %v1896_v38 = vpop.f32.mrf.mxu0 }
0x17f3   : > { %v1994_v36 = vmax.f32 %v1954_v32, 0.0 }
0x17f4   : > { %3348 = vmatmul.mubr.f32.gmra.mxu0 %v1970_v34  ;;  %v1993_v34 = vmax.f32 %v1953_v29, 0.0  ;;  %v3305_v41 = vpop.f32.mrf.mxu0 }
0x17f5   : > { %3350 = vmatprep.mubr.f32.mxu0 %v1971_v37  ;;  %v1956_v37 = vadd.f32 %v3296_v16, %v4235_v13 }
0x17f6   : > { %v1906_v27 = vpop.f32.mrf.mxu0 }
0x17f7   : > { %v1961_v50 = vadd.f32 %v1906_v27, %v4233_v11 }
0x17f8   : > { %3351 = vmatmul.mubr.f32.gmra.mxu0 %v1972_v40  ;;  %v1957_v40 = vadd.f32 %v1886_v30, %v4233_v11 }
0x17f9   : > { %3353 = vmatprep.mubr.f32.mxu0 %v1973_v42  ;;  %v1996_v42 = vmax.f32 %v1956_v37, 0.0  ;;  %v2001_v55 = vmax.f32 %v1961_v50, 0.0 }
0x17fa   : > { %v1997_v44 = vmax.f32 %v1957_v40, 0.0 }
0x17fc   : > { %3354 = vmatmul.mubr.f32.gmra.mxu0 %v1974_v45  ;;  %v1959_v45 = vadd.f32 %v1896_v38, %v4233_v11 }
0x17fd   : > { %3356 = vmatprep.mubr.f32.mxu0 %v1975_v0  ;;  %v381_v0 = vld [vmem:[#allocation5 + $0x20] sm:$0xff] }
0x17fe   : > { %3423 = vmatprep.subr.mxu1 %v381_v0  ;;  %v1999_v49 = vmax.f32 %v1959_v45, 0.0 }
0x17ff   : > { %3424 = vmatpush3.msra.mxu1 %v381_v0 }
0x1800   : > { %3357 = vmatmul.mubr.f32.gmra.mxu0 %v1976_v48  ;;  %v1960_v48 = vadd.f32 %v3302_v33, %v4235_v13 }
0x1801   : > { %3359 = vmatprep.mubr.f32.mxu0 %v1977_v51  ;;  %v380_v51 = vld [vmem:[#allocation5 + $0x18] sm:$0xff] }
0x1802   : > { %3425 = vmatprep.subr.mxu1 %v380_v51  ;;  %v2000_v53 = vmax.f32 %v1960_v48, 0.0 }
0x1803   : > { %3426 = vmatpush3.msra.mxu1 %v380_v51 }
0x1804   : > { %3360 = vmatmul.mubr.f32.gmra.mxu0 %v1978_v54  ;;  %v1962_v54 = vadd.f32 %v3305_v41, %v4235_v13  ;;  %3427 = vmatprep.subr.mxu1 %v379_v52 }
0x1805   : > { %3362 = vmatprep.mubr.f32.mxu0 %v1979_v56  ;;  %3428 = vmatpush3.msra.mxu1 %v379_v52  ;;  %v378_v56 = vld [vmem:[#allocation5 + $0x8] sm:$0xff] }
0x1806   : > { %3429 = vmatprep.subr.mxu1 %v378_v56  ;;  %v2002_v58 = vmax.f32 %v1962_v54, 0.0 }
0x1807   : > { %3430 = vmatpush3.msra.mxu1 %v378_v56 }
0x1808   : > { %3363 = vmatmul.mubr.f32.gmra.mxu0 %v1980_v59  ;;  %3431 = vmatprep.subr.mxu1 %v377_v57 }
0x1809   : > { %3365 = vmatprep.mubr.f32.mxu0 %v1981_v62  ;;  %3432 = vmatpush3.msra.mxu1 %v377_v57 }
0x180c   : > { %3366 = vmatmul.mubr.f32.gmra.mxu0 %v1982_v1 }
0x180d   : > { %3368 = vmatprep.mubr.f32.mxu0 %v1983_v4 }
0x1810   : > { %3369 = vmatmul.mubr.f32.gmra.mxu0 %v1984_v7 }
0x1811   : > { %3371 = vmatprep.mubr.f32.mxu0 %v1985_v9 }
0x1814   : > { %3372 = vmatmul.mubr.f32.gmra.mxu0 %v1986_v14 }
0x1815   : > { %3374 = vmatprep.mubr.f32.mxu0 %v1987_v17 }
0x1818   : > { %3375 = vmatmul.mubr.f32.gmra.mxu0 %v1988_v19 }
0x1819   : > { %3377 = vmatprep.mubr.f32.mxu0 %v1989_v22 }
0x181c   : > { %3378 = vmatmul.mubr.f32.gmra.mxu0 %v1990_v25 }
0x181d   : > { %3380 = vmatprep.mubr.f32.mxu0 %v1991_v28 }
0x1820   : > { %3381 = vmatmul.mubr.f32.gmra.mxu0 %v1992_v31 }
0x1821   : > { %3383 = vmatprep.mubr.f32.mxu0 %v1993_v34 }
0x1824   : > { %3384 = vmatmul.mubr.f32.gmra.mxu0 %v1994_v36 }
0x1825   : > { %3386 = vmatprep.mubr.f32.mxu0 %v1995_v39 }
0x1828   : > { %3387 = vmatmul.mubr.f32.gmra.mxu0 %v1996_v42 }
0x1829   : > { %3389 = vmatprep.mubr.f32.mxu0 %v1997_v44 }
0x182c   : > { %3390 = vmatmul.mubr.f32.gmra.mxu0 %v1998_v47 }
0x182d   : > { %3392 = vmatprep.mubr.f32.mxu0 %v1999_v49 }
0x1830   : > { %3393 = vmatmul.mubr.f32.gmra.mxu0 %v2000_v53 }
0x1831   : > { %3395 = vmatprep.mubr.f32.mxu0 %v2001_v55 }
0x1834   : > { %3396 = vmatmul.mubr.f32.gmra.mxu0 %v2002_v58 }
0x18a8   : > { %v3308_v59 = vpop.f32.mrf.mxu0 }
0x18a9   : > { %v1964_v60 = vadd.f32 %v3308_v59, %v4235_v13 }
0x18aa   : > { %v1916_v61 = vpop.f32.mrf.mxu0 }
0x18ab   : > { %v1963_v62 = vadd.f32 %v1916_v61, %v4233_v11  ;;  %v2004_v3 = vmax.f32 %v1964_v60, 0.0 }
0x18ac   : > { %v3343_v1 = vpop.f32.mrf.mxu0 }
0x18ad   : > { %v2003_v2 = vmax.f32 %v1963_v62, 0.0  ;;  %v2083_v4 = vadd.f32 %v3343_v1, %v4282_v63 }
0x18ae   : > { %v2077_v5 = vpop.f32.mrf.mxu0 }
0x18af   : > { %v2078_v6 = vadd.f32 %v4282_v63, %v2077_v5  ;;  %3398 = vmatprep.mubr.f32.mxu0 %v2003_v2  ;;  %v2277_v8 = vmax.f32 %v2083_v4, 0.0 }
0x18b0   : > { %v3346_v7 = vpop.f32.mrf.mxu0  ;;  %3399 = vmatmul.mubr.f32.gmra.mxu0 %v2004_v3 }
0x18b1   : > { %v2276_v13 = vmax.f32 %v2078_v6, 0.0  ;;  %v2093_v11 = vadd.f32 %v3346_v7, %v4282_v63 }
0x18b2   : > { %v2087_v9 = vpop.f32.mrf.mxu0 }
0x18b3   : > { %v2088_v10 = vadd.f32 %v4282_v63, %v2087_v9  ;;  %3433 = vmatprep.mubr.f32.mxu1 %v2276_v13  ;;  %v2279_v15 = vmax.f32 %v2093_v11, 0.0 }
0x18b4   : > { %v3349_v12 = vpop.f32.mrf.mxu0  ;;  %3434 = vmatmul.mubr.f32.vlgmr.msra.gmra.mxu1 %v2277_v8 }
0x18b5   : > { %v2278_v14 = vmax.f32 %v2088_v10, 0.0  ;;  %v2103_v16 = vadd.f32 %v3349_v12, %v4282_v63 }
0x18b6   : > { %v2097_v17 = vpop.f32.mrf.mxu0 }
0x18b7   : > { %v2098_v18 = vadd.f32 %v4282_v63, %v2097_v17  ;;  %3436 = vmatprep.mubr.f32.mxu1 %v2278_v14  ;;  %v2281_v21 = vmax.f32 %v2103_v16, 0.0 }
0x18b8   : > { %v3352_v19 = vpop.f32.mrf.mxu0  ;;  %3437 = vmatmul.mubr.f32.gmra.mxu1 %v2279_v15 }
0x18b9   : > { %v2280_v20 = vmax.f32 %v2098_v18, 0.0  ;;  %v2113_v22 = vadd.f32 %v3352_v19, %v4282_v63 }
0x18ba   : > { %v2107_v23 = vpop.f32.mrf.mxu0 }
0x18bb   : > { %v2108_v24 = vadd.f32 %v4282_v63, %v2107_v23  ;;  %3439 = vmatprep.mubr.f32.mxu1 %v2280_v20  ;;  %v2283_v28 = vmax.f32 %v2113_v22, 0.0 }
0x18bc   : > { %v3355_v25 = vpop.f32.mrf.mxu0  ;;  %3440 = vmatmul.mubr.f32.gmra.mxu1 %v2281_v21 }
0x18bd   : > { %v2282_v26 = vmax.f32 %v2108_v24, 0.0  ;;  %v2123_v29 = vadd.f32 %v3355_v25, %v4282_v63 }
0x18be   : > { %v2117_v30 = vpop.f32.mrf.mxu0 }
0x18bf   : > { %v2118_v31 = vadd.f32 %v4282_v63, %v2117_v30  ;;  %3442 = vmatprep.mubr.f32.mxu1 %v2282_v26  ;;  %v2285_v34 = vmax.f32 %v2123_v29, 0.0 }
0x18c0   : > { %v3358_v32 = vpop.f32.mrf.mxu0  ;;  %3443 = vmatmul.mubr.f32.gmra.mxu1 %v2283_v28 }
0x18c1   : > { %v2284_v33 = vmax.f32 %v2118_v31, 0.0  ;;  %v2133_v35 = vadd.f32 %v3358_v32, %v4282_v63 }
0x18c2   : > { %v2127_v36 = vpop.f32.mrf.mxu0 }
0x18c3   : > { %v2128_v37 = vadd.f32 %v4282_v63, %v2127_v36  ;;  %3445 = vmatprep.mubr.f32.mxu1 %v2284_v33  ;;  %v2287_v40 = vmax.f32 %v2133_v35, 0.0 }
0x18c4   : > { %v3361_v38 = vpop.f32.mrf.mxu0  ;;  %3446 = vmatmul.mubr.f32.gmra.mxu1 %v2285_v34 }
0x18c5   : > { %v2286_v39 = vmax.f32 %v2128_v37, 0.0  ;;  %v2143_v41 = vadd.f32 %v3361_v38, %v4282_v63 }
0x18c6   : > { %v2137_v42 = vpop.f32.mrf.mxu0 }
0x18c7   : > { %v2138_v43 = vadd.f32 %v4282_v63, %v2137_v42  ;;  %3448 = vmatprep.mubr.f32.mxu1 %v2286_v39  ;;  %v2289_v46 = vmax.f32 %v2143_v41, 0.0 }
0x18c8   : > { %v3364_v44 = vpop.f32.mrf.mxu0  ;;  %3449 = vmatmul.mubr.f32.gmra.mxu1 %v2287_v40 }
0x18c9   : > { %v2288_v45 = vmax.f32 %v2138_v43, 0.0  ;;  %v2153_v27 = vadd.f32 %v3364_v44, %v4282_v63 }
0x18ca   : > { %v2147_v0 = vpop.f32.mrf.mxu0 }
0x18cb   : > { %v2148_v47 = vadd.f32 %v4282_v63, %v2147_v0  ;;  %3451 = vmatprep.mubr.f32.mxu1 %v2288_v45  ;;  %v2291_v50 = vmax.f32 %v2153_v27, 0.0 }
0x18cc   : > { %v3367_v48 = vpop.f32.mrf.mxu0  ;;  %3452 = vmatmul.mubr.f32.gmra.mxu1 %v2289_v46 }
0x18cd   : > { %v2290_v49 = vmax.f32 %v2148_v47, 0.0  ;;  %v2163_v51 = vadd.f32 %v3367_v48, %v4282_v63 }
0x18ce   : > { %v2157_v52 = vpop.f32.mrf.mxu0 }
0x18cf   : > { %v2158_v53 = vadd.f32 %v4282_v63, %v2157_v52  ;;  %3454 = vmatprep.mubr.f32.mxu1 %v2290_v49  ;;  %v2293_v56 = vmax.f32 %v2163_v51, 0.0 }
0x18d0   : > { %v3370_v54 = vpop.f32.mrf.mxu0  ;;  %3455 = vmatmul.mubr.f32.gmra.mxu1 %v2291_v50 }
0x18d1   : > { %v2292_v55 = vmax.f32 %v2158_v53, 0.0  ;;  %v2173_v57 = vadd.f32 %v3370_v54, %v4282_v63 }
0x18d2   : > { %v2167_v58 = vpop.f32.mrf.mxu0 }
0x18d3   : > { %v2168_v59 = vadd.f32 %v4282_v63, %v2167_v58  ;;  %3457 = vmatprep.mubr.f32.mxu1 %v2292_v55  ;;  %v2295_v62 = vmax.f32 %v2173_v57, 0.0 }
0x18d4   : > { %v3373_v60 = vpop.f32.mrf.mxu0  ;;  %3458 = vmatmul.mubr.f32.gmra.mxu1 %v2293_v56 }
0x18d5   : > { %v2294_v61 = vmax.f32 %v2168_v59, 0.0  ;;  %v2183_v1 = vadd.f32 %v3373_v60, %v4282_v63 }
0x18d6   : > { %v2177_v2 = vpop.f32.mrf.mxu0 }
0x18d7   : > { %v2178_v3 = vadd.f32 %v4282_v63, %v2177_v2  ;;  %3460 = vmatprep.mubr.f32.mxu1 %v2294_v61  ;;  %v2297_v6 = vmax.f32 %v2183_v1, 0.0 }
0x18d8   : > { %v3376_v4 = vpop.f32.mrf.mxu0  ;;  %3461 = vmatmul.mubr.f32.gmra.mxu1 %v2295_v62 }
0x18d9   : > { %v2296_v5 = vmax.f32 %v2178_v3, 0.0  ;;  %v2193_v7 = vadd.f32 %v3376_v4, %v4282_v63 }
0x18da   : > { %v2187_v13 = vpop.f32.mrf.mxu0 }
0x18db   : > { %v2188_v8 = vadd.f32 %v4282_v63, %v2187_v13  ;;  %3463 = vmatprep.mubr.f32.mxu1 %v2296_v5  ;;  %v2299_v10 = vmax.f32 %v2193_v7, 0.0 }
0x18dc   : > { %v3379_v11 = vpop.f32.mrf.mxu0  ;;  %3464 = vmatmul.mubr.f32.gmra.mxu1 %v2297_v6 }
0x18dd   : > { %v2298_v9 = vmax.f32 %v2188_v8, 0.0  ;;  %v2203_v12 = vadd.f32 %v3379_v11, %v4282_v63 }
0x18de   : > { %v2197_v14 = vpop.f32.mrf.mxu0 }
0x18df   : > { %v2198_v15 = vadd.f32 %v4282_v63, %v2197_v14  ;;  %3466 = vmatprep.mubr.f32.mxu1 %v2298_v9  ;;  %v2301_v18 = vmax.f32 %v2203_v12, 0.0 }
0x18e0   : > { %v3382_v16 = vpop.f32.mrf.mxu0  ;;  %3467 = vmatmul.mubr.f32.gmra.mxu1 %v2299_v10 }
0x18e1   : > { %v2300_v17 = vmax.f32 %v2198_v15, 0.0  ;;  %v2213_v19 = vadd.f32 %v3382_v16, %v4282_v63 }
0x18e2   : > { %v2207_v20 = vpop.f32.mrf.mxu0 }
0x18e3   : > { %v2208_v21 = vadd.f32 %v4282_v63, %v2207_v20  ;;  %3469 = vmatprep.mubr.f32.mxu1 %v2300_v17  ;;  %v2303_v24 = vmax.f32 %v2213_v19, 0.0 }
0x18e4   : > { %v3385_v22 = vpop.f32.mrf.mxu0  ;;  %3470 = vmatmul.mubr.f32.gmra.mxu1 %v2301_v18 }
0x18e5   : > { %v2302_v23 = vmax.f32 %v2208_v21, 0.0  ;;  %v2223_v25 = vadd.f32 %v3385_v22, %v4282_v63 }
0x18e6   : > { %v2217_v26 = vpop.f32.mrf.mxu0 }
0x18e7   : > { %v2218_v28 = vadd.f32 %v4282_v63, %v2217_v26  ;;  %3472 = vmatprep.mubr.f32.mxu1 %v2302_v23  ;;  %v2305_v31 = vmax.f32 %v2223_v25, 0.0 }
0x18e8   : > { %v3388_v29 = vpop.f32.mrf.mxu0  ;;  %3473 = vmatmul.mubr.f32.gmra.mxu1 %v2303_v24 }
0x18e9   : > { %v2304_v30 = vmax.f32 %v2218_v28, 0.0  ;;  %v2233_v32 = vadd.f32 %v3388_v29, %v4282_v63  ;;  %v4343_v28 = vld [vmem:[%s4474_s7] ss:$0 sm:$0xff] }
0x18ea   : > { %v2227_v33 = vpop.f32.mrf.mxu0 }
0x18eb   : > { %v2228_v34 = vadd.f32 %v4282_v63, %v2227_v33  ;;  %3475 = vmatprep.mubr.f32.mxu1 %v2304_v30  ;;  %v2307_v37 = vmax.f32 %v2233_v32, 0.0 }
0x18ec   : > { %v3391_v35 = vpop.f32.mrf.mxu0  ;;  %3476 = vmatmul.mubr.f32.gmra.mxu1 %v2305_v31 }
0x18ed   : > { %v2306_v36 = vmax.f32 %v2228_v34, 0.0  ;;  %v2243_v38 = vadd.f32 %v3391_v35, %v4282_v63 }
0x18ee   : > { %v2237_v39 = vpop.f32.mrf.mxu0 }
0x18ef   : > { %v2238_v40 = vadd.f32 %v4282_v63, %v2237_v39  ;;  %3478 = vmatprep.mubr.f32.mxu1 %v2306_v36  ;;  %v2309_v43 = vmax.f32 %v2243_v38, 0.0 }
0x18f0   : > { %v3394_v41 = vpop.f32.mrf.mxu0  ;;  %3479 = vmatmul.mubr.f32.gmra.mxu1 %v2307_v37 }
0x18f1   : > { %v2308_v42 = vmax.f32 %v2238_v40, 0.0  ;;  %v2253_v44 = vadd.f32 %v3394_v41, %v4282_v63 }
0x18f2   : > { %v2247_v45 = vpop.f32.mrf.mxu0 }
0x18f3   : > { %v2248_v46 = vadd.f32 %v4282_v63, %v2247_v45  ;;  %3481 = vmatprep.mubr.f32.mxu1 %v2308_v42  ;;  %v2311_v47 = vmax.f32 %v2253_v44, 0.0 }
0x18f4   : > { %v3397_v27 = vpop.f32.mrf.mxu0  ;;  %3482 = vmatmul.mubr.f32.gmra.mxu1 %v2309_v43 }
0x18f5   : > { %v2310_v0 = vmax.f32 %v2248_v46, 0.0  ;;  %v2263_v48 = vadd.f32 %v3397_v27, %v4282_v63 }
0x18f6   : > { %v2257_v49 = vpop.f32.mrf.mxu0 }
0x18f7   : > { %v2258_v50 = vadd.f32 %v4282_v63, %v2257_v49  ;;  %3484 = vmatprep.mubr.f32.mxu1 %v2310_v0  ;;  %v2313_v52 = vmax.f32 %v2263_v48, 0.0 }
0x18f8   : > { %3485 = vmatmul.mubr.f32.gmra.mxu1 %v2311_v47 }
0x18f9   : > { %v2312_v51 = vmax.f32 %v2258_v50, 0.0 }
0x18fb   : > { %3487 = vmatprep.mubr.f32.mxu1 %v2312_v51 }
0x18fc   : > { %3488 = vmatmul.mubr.f32.gmra.mxu1 %v2313_v52 }
0x1970   : > { %v3400_v53 = vpop.f32.mrf.mxu0 }
0x1971   : > { %v2273_v54 = vadd.f32 %v3400_v53, %v4282_v63 }
0x1972   : > { %v2267_v55 = vpop.f32.mrf.mxu0 }
0x1973   : > { %v2268_v56 = vadd.f32 %v4282_v63, %v2267_v55  ;;  %v2315_v58 = vmax.f32 %v2273_v54, 0.0 }
0x1974   : > { %v3435_v59 = vpop.f32.mrf.mxu1 }
0x1975   : > { %v2314_v57 = vmax.f32 %v2268_v56, 0.0  ;;  %v2394_v31 = vadd.f32 %v3435_v59, %v4343_v28 }
0x1976   : > { %v2388_v60 = vpop.f32.mrf.mxu1 }
0x1977   : > { %3490 = vmatprep.mubr.f32.mxu1 %v2314_v57  ;;  %v2389_v32 = vadd.f32 %v4343_v28, %v2388_v60  ;;  %v2588_v40 = vmax.f32 %v2394_v31, 0.0 }
0x1978   : > { %3491 = vmatmul.mubr.f32.gmra.mxu1 %v2315_v58  ;;  %v3438_v61 = vpop.f32.mrf.mxu1 }
0x1979   : > { %v2404_v35 = vadd.f32 %v3438_v61, %v4343_v28  ;;  %v2587_v42 = vmax.f32 %v2389_v32, 0.0 }
0x197a   : > { %v2398_v62 = vpop.f32.mrf.mxu1 }
0x197b   : > { %v2399_v37 = vadd.f32 %v4343_v28, %v2398_v62  ;;  %v2590_v46 = vmax.f32 %v2404_v35, 0.0 }
0x197c   : > { %v3441_v1 = vpop.f32.mrf.mxu1 }
0x197d   : > { %v2414_v30 = vadd.f32 %v3441_v1, %v4343_v28  ;;  %v2589_v49 = vmax.f32 %v2399_v37, 0.0 }
0x197e   : > { %v2408_v2 = vpop.f32.mrf.mxu1 }
0x197f   : > { %v2409_v33 = vadd.f32 %v4343_v28, %v2408_v2  ;;  %v2592_v38 = vmax.f32 %v2414_v30, 0.0 }
0x1980   : > { %v3444_v3 = vpop.f32.mrf.mxu1 }
0x1981   : > { %v2424_v34 = vadd.f32 %v3444_v3, %v4343_v28  ;;  %v2591_v43 = vmax.f32 %v2409_v33, 0.0  ;;  %v2646_v50 = vmax.f32 %v2588_v40, %v2592_v38 }
0x1982   : > { %v2418_v4 = vpop.f32.mrf.mxu1 }
0x1983   : > { %v2419_v39 = vadd.f32 %v4343_v28, %v2418_v4  ;;  %v2594_v44 = vmax.f32 %v2424_v34, 0.0  ;;  %v2627_v57 = vmax.f32 %v2587_v42, %v2591_v43 }
0x1984   : > { %v3447_v5 = vpop.f32.mrf.mxu1 }
0x1985   : > { %v2434_v41 = vadd.f32 %v3447_v5, %v4343_v28  ;;  %v2593_v51 = vmax.f32 %v2419_v39, 0.0  ;;  %v2647_v58 = vmax.f32 %v2590_v46, %v2594_v44 }
0x1986   : > { %v2428_v6 = vpop.f32.mrf.mxu1 }
0x1987   : > { %v2429_v45 = vadd.f32 %v4343_v28, %v2428_v6  ;;  %v2596_v53 = vmax.f32 %v2434_v41, 0.0  ;;  %v2628_v4 = vmax.f32 %v2589_v49, %v2593_v51 }
0x1988   : > { %v3450_v7 = vpop.f32.mrf.mxu1 }
0x1989   : > { %v2444_v27 = vadd.f32 %v3450_v7, %v4343_v28  ;;  %v2595_v59 = vmax.f32 %v2429_v45, 0.0 }
0x198a   : > { %v2438_v13 = vpop.f32.mrf.mxu1 }
0x198b   : > { %v2439_v0 = vadd.f32 %v4343_v28, %v2438_v13  ;;  %v2598_v61 = vmax.f32 %v2444_v27, 0.0  ;;  %v2648_v13 = vmax.f32 %v2646_v50, %v2596_v53 }
0x198c   : > { %v3453_v8 = vpop.f32.mrf.mxu1 }
0x198d   : > { %v2454_v47 = vadd.f32 %v3453_v8, %v4343_v28  ;;  %v2597_v62 = vmax.f32 %v2439_v0, 0.0  ;;  %v2649_v31 = vmax.f32 %v2647_v58, %v2598_v61 }
0x198e   : > { %v2448_v11 = vpop.f32.mrf.mxu1 }
0x198f   : > { %v2449_v52 = vadd.f32 %v4343_v28, %v2448_v11  ;;  %v2600_v1 = vmax.f32 %v2454_v47, 0.0  ;;  %v2630_v32 = vmax.f32 %v2628_v4, %v2597_v62 }
0x1990   : > { %v3456_v9 = vpop.f32.mrf.mxu1 }
0x1991   : > { %v2464_v54 = vadd.f32 %v3456_v9, %v4343_v28  ;;  %v2599_v5 = vmax.f32 %v2449_v52, 0.0 }
0x1992   : > { %v2458_v63 = vpop.f32.mrf.mxu1 }
0x1993   : > { %v2459_v55 = vadd.f32 %v4343_v28, %v2458_v63  ;;  %v2602_v8 = vmax.f32 %v2464_v54, 0.0  ;;  %v2629_v63 = vmax.f32 %v2627_v57, %v2595_v59 }
0x1994   : > { %v3459_v10 = vpop.f32.mrf.mxu1 }
0x1995   : > { %v2474_v56 = vadd.f32 %v3459_v10, %v4343_v28  ;;  %v2601_v11 = vmax.f32 %v2459_v55, 0.0  ;;  %v2631_v35 = vmax.f32 %v2629_v63, %v2599_v5  ;;  %v2651_v38 = vmax.f32 %v2649_v31, %v2602_v8 }
0x1996   : > { %v2468_v12 = vpop.f32.mrf.mxu1 }
0x1997   : > { %v2469_v60 = vadd.f32 %v4343_v28, %v2468_v12  ;;  %v2604_v9 = vmax.f32 %v2474_v56, 0.0  ;;  %v2632_v39 = vmax.f32 %v2630_v32, %v2601_v11 }
0x1998   : > { %v3462_v14 = vpop.f32.mrf.mxu1 }
0x1999   : > { %v2484_v2 = vadd.f32 %v3462_v14, %v4343_v28  ;;  %v2603_v10 = vmax.f32 %v2469_v60, 0.0  ;;  %v2650_v14 = vmax.f32 %v2648_v13, %v2600_v1 }
0x199a   : > { %v2478_v15 = vpop.f32.mrf.mxu1 }
0x199b   : > { %v2479_v6 = vadd.f32 %v4343_v28, %v2478_v15  ;;  %v2606_v33 = vmax.f32 %v2484_v2, 0.0  ;;  %v2652_v40 = vmax.f32 %v2650_v14, %v2604_v9 }
0x199c   : > { %v3465_v16 = vpop.f32.mrf.mxu1 }
0x199d   : > { %v2494_v7 = vadd.f32 %v3465_v16, %v4343_v28  ;;  %v2605_v37 = vmax.f32 %v2479_v6, 0.0  ;;  %v2653_v44 = vmax.f32 %v2651_v38, %v2606_v33 }
0x199e   : > { %v2488_v17 = vpop.f32.mrf.mxu1 }
0x199f   : > { %v2489_v12 = vadd.f32 %v4343_v28, %v2488_v17  ;;  %v2608_v15 = vmax.f32 %v2494_v7, 0.0  ;;  %v2633_v17 = vmax.f32 %v2631_v35, %v2603_v10  ;;  %v2634_v0 = vmax.f32 %v2632_v39, %v2605_v37 }
0x19a0   : > { %v3468_v18 = vpop.f32.mrf.mxu1 }
0x19a1   : > { %v2504_v30 = vadd.f32 %v3468_v18, %v4343_v28  ;;  %v2607_v42 = vmax.f32 %v2489_v12, 0.0  ;;  %v2654_v47 = vmax.f32 %v2652_v40, %v2608_v15 }
0x19a2   : > { %v4324_v19 = vpop.f32.mrf.mxu1 }
0x19a3   : > { %v2499_v16 = vadd.f32 %v4343_v28, %v4324_v19  ;;  %v2610_v18 = vmax.f32 %v2504_v30, 0.0  ;;  %v2635_v51 = vmax.f32 %v2633_v17, %v2607_v42 }
0x19a4   : > { %v4326_v20 = vpop.f32.mrf.mxu1 }
0x19a5   : > { %v2514_v41 = vadd.f32 %v4326_v20, %v4343_v28  ;;  %v2609_v20 = vmax.f32 %v2499_v16, 0.0 }
0x19a6   : > { %v4328_v21 = vpop.f32.mrf.mxu1 }
0x19a7   : > { %v2509_v45 = vadd.f32 %v4343_v28, %v4328_v21  ;;  %v2612_v50 = vmax.f32 %v2514_v41, 0.0 }
0x19a8   : > { %v4330_v22 = vpop.f32.mrf.mxu1 }
0x19a9   : > { %v2524_v43 = vadd.f32 %v4330_v22, %v4343_v28  ;;  %v2611_v54 = vmax.f32 %v2509_v45, 0.0  ;;  %v2656_v59 = vmax.f32 %v2654_v47, %v2612_v50 }
0x19aa   : > { %v4332_v23 = vpop.f32.mrf.mxu1 }
0x19ab   : > { %v2519_v46 = vadd.f32 %v4343_v28, %v4332_v23  ;;  %v2614_v52 = vmax.f32 %v2524_v43, 0.0 }
0x19ac   : > { %v4334_v24 = vpop.f32.mrf.mxu1 }
0x19ad   : > { %v2534_v19 = vadd.f32 %v4334_v24, %v4343_v28  ;;  %v2655_v24 = vmax.f32 %v2653_v44, %v2610_v18  ;;  %v2613_v55 = vmax.f32 %v2519_v46, 0.0 }
0x19ae   : > { %v4336_v25 = vpop.f32.mrf.mxu1 }
0x19af   : > { %v2529_v22 = vadd.f32 %v4343_v28, %v4336_v25  ;;  %v2616_v56 = vmax.f32 %v2534_v19, 0.0  ;;  %v2636_v25 = vmax.f32 %v2634_v0, %v2609_v20  ;;  %v2657_v1 = vmax.f32 %v2655_v24, %v2614_v52 }
0x19b0   : > { %v4338_v26 = vpop.f32.mrf.mxu1 }
0x19b1   : > { %v2544_v49 = vadd.f32 %v4338_v26, %v4343_v28  ;;  %v2615_v60 = vmax.f32 %v2529_v22, 0.0  ;;  %v2638_v4 = vmax.f32 %v2636_v25, %v2613_v55  ;;  %v2658_v5 = vmax.f32 %v2656_v59, %v2616_v56 }
0x19b2   : > { %v4345_v29 = vpop.f32.mrf.mxu1 }
0x19b3   : > { %v2539_v21 = vadd.f32 %v4343_v28, %v4345_v29  ;;  %v2618_v58 = vmax.f32 %v2544_v49, 0.0 }
0x19b4   : > { %v4353_v36 = vpop.f32.mrf.mxu1 }
0x19b5   : > { %v2554_v23 = vadd.f32 %v4353_v36, %v4343_v28  ;;  %v2617_v61 = vmax.f32 %v2539_v21, 0.0  ;;  %v2659_v13 = vmax.f32 %v2657_v1, %v2618_v58 }
0x19b6   : > { %v4362_v48 = vpop.f32.mrf.mxu1 }
0x19b7   : > { %v2549_v26 = vadd.f32 %v4343_v28, %v4362_v48  ;;  %v2620_v62 = vmax.f32 %v2554_v23, 0.0  ;;  %v2637_v48 = vmax.f32 %v2635_v51, %v2611_v54  ;;  %v2640_v10 = vmax.f32 %v2638_v4, %v2617_v61 }
0x19b8   : > { %v3486_v3 = vpop.f32.mrf.mxu1 }
0x19b9   : > { %v2564_v53 = vadd.f32 %v3486_v3, %v4343_v28  ;;  %v2619_v6 = vmax.f32 %v2549_v26, 0.0  ;;  %v2639_v63 = vmax.f32 %v2637_v48, %v2615_v60  ;;  %v2660_v12 = vmax.f32 %v2658_v5, %v2620_v62 }
0x19ba   : > { %v2558_v34 = vpop.f32.mrf.mxu1 }
0x19bb   : > { %v2559_v29 = vadd.f32 %v4343_v28, %v2558_v34  ;;  %v2622_v2 = vmax.f32 %v2564_v53, 0.0  ;;  %v2641_v34 = vmax.f32 %v2639_v63, %v2619_v6 }
0x19bc   : > { %v3489_v27 = vpop.f32.mrf.mxu1 }
0x19bd   : > { %v2574_v36 = vadd.f32 %v3489_v27, %v4343_v28  ;;  %v2621_v8 = vmax.f32 %v2559_v29, 0.0  ;;  %v2661_v31 = vmax.f32 %v2659_v13, %v2622_v2 }
0x19be   : > { %v2568_v57 = vpop.f32.mrf.mxu1 }
0x19bf   : > { %v2569_v3 = vadd.f32 %v4343_v28, %v2568_v57  ;;  %v2624_v11 = vmax.f32 %v2574_v36, 0.0  ;;  %v2642_v35 = vmax.f32 %v2640_v10, %v2621_v8 }
0x19c1   : > { %v2623_v32 = vmax.f32 %v2569_v3, 0.0  ;;  %v2662_v37 = vmax.f32 %v2660_v12, %v2624_v11 }
0x19c3   : > { %v2643_v38 = vmax.f32 %v2641_v34, %v2623_v32 }
0x1a38   : > { %v3492_v7 = vpop.f32.mrf.mxu1 }
0x1a39   : > { %v2584_v9 = vadd.f32 %v3492_v7, %v4343_v28 }
0x1a3a   : > { %v2578_v30 = vpop.f32.mrf.mxu1 }
0x1a3b   : > { %v2626_v14 = vmax.f32 %v2584_v9, 0.0  ;;  %v2579_v33 = vadd.f32 %v4343_v28, %v2578_v30 }
0x1a3d   : > { %v2663_v15 = vmax.f32 %v2661_v31, %v2626_v14  ;;  %v2625_v16 = vmax.f32 %v2579_v33, 0.0 }
0x1a3f   : > { %v2664_v39 = vmax.f32 %v2662_v37, %v2663_v15  ;;  %v2644_v40 = vmax.f32 %v2642_v35, %v2625_v16 }
0x1a41   : > { %2666 = vst [vmem:[%s342_s30 + $0x8] sm:$0xff] %v2664_v39  ;;  %v2645_v28 = vmax.f32 %v2643_v38, %v2644_v40 }
0x1a43   : > { %2665 = vst [vmem:[%s342_s30] sm:$0xff] %v2645_v28 }
0x1a44   : > { %3657 = shalt.err (!%p3654_p4)
}
0x1a45   : > { %s3658_s23 = scalar_lea.hbm %s4412_s13, 256  ;;  %s3662_s17 = scalar_lea.hbm %s4475_s8, 1024 }
0x1a46   : > { %p3659_p5 = scmp.ne.s32.totalorder %s4412_s13, %s3658_s23  ;;  %p3663_p9 = scmp.lt.s32.totalorder %s4412_s13, %s4475_s8 }
0x1a47   : > { %p3664_p1 = scmp.lt.s32.totalorder %s3662_s17, %s3658_s23 }
0x1a48   : > { %p3660_p6 = pnand %p3659_p5, %p3853_p3 }
0x1a49   : > { %p3665_p10 = por %p3664_p1, %p3663_p9 }
0x1a4a   : > { %p3661_p7 = pneg %p3660_p6 }
0x1a4c   : > { %p3666_p12 = pnand %p3665_p10, %p3661_p7 }
0x1a4e   : > { %3669 = shalt.err (!%p3666_p12)
}
0x1a4f   : > { %s3754_s22 = smov 128   ;;  %s3755_s26 = smov 8  }
0x1a50   : > { %3501 = dma.vmem_to_hbm [thread:$0]  (%p3853_p3), %s4407_s9, 256, %s4412_s13, %s4416_s10, %s3754_s22, %s3754_s22, %s3755_s26  }
0x1a51 PF: > { %p3518_p0 = scmp.ge.s32.totalorder %s3744_s12, 2  ;;  %s2698_s11 = sand.u32 1, %s3716_s27  }
0x1a52   : > { %s2699_s15 = scalar_lea.sflag [#allocation4], %s2698_s11 }
0x1a53   : > { %p3511_p11 = pnand %p3518_p0, %p3862_p8 }
0x1a55   : > { %p3512_p13 = pneg %p3511_p11 }
0x1a57   : > { %3711 = dma.done.wait (%p3512_p13), %s2699_s15, 256  }
0x1a58   : > { %3713 = vsyncadd (%p3512_p13), %s2699_s15, 4294967040  ;;  %s23_s12 = sadd.s32 1, %s3744_s12   ;;  %s4489_s30 = sld [smem:[#allocation11_spill]] }
0x1a59   : > { %p20_p2 = scmp.ge.s32.totalorder %s23_s12, 6   ;;  %s4490_s9 = sld [smem:[#allocation12_spill]] }
0x1a5a   : > { %s4491_s10 = sld [smem:[#allocation13_spill]]  ;;  %s4493_s27 = smov %s3720_s28 }
0x1a5b   : > { %s4492_s11 = sld [smem:[#allocation14_spill]]  ;;  %s4494_s28 = smov %s3724_s29 }
0x1a5c   : > { %s4495_s29 = smov %s3880_s25  ;;  %22 = sbr.rel (!%p20_p2) target bundleno = 7 (0x7), region = 97 }
0x1a61   :  { %2704 = vsyncpa [#allocation3], 1 }
0x1a62   :  { %2706 = vsyncpa [#allocation3 + $0x1], 1 }
0x1a63   :  { %2707 = vsyncpa [#allocation6], 1 }
0x1a64   :  { %2708 = vsyncpa [#allocation4], 1 }
0x1a65   :  { %2710 = vsyncpa [#allocation4 + $0x1], 1 }

</bundles_post_ra>
